<compile_context>
chip_gen: v7x
topology: tpu7x:2x2x1
jax: 0.10.0
libtpu: 0.0.40
codegen_flags: <defaults>
</compile_context>

<pallas_src>
import jax
import jax.numpy as jnp
from jax import lax
from jax.experimental import pallas as pl
from jax.experimental.pallas import tpu as pltpu

LANES = 128   # vreg lane width (fast axis); batch is mapped onto lanes
SLAB = 32     # rows per inner slab = 4 f32 vregs; x/acc stay vreg-resident across H


def mlp_kernel(w1_ref, b1_ref, w2_ref, b2_ref, x_ref, o_ref):
    """Per-tile fused MLP using the tanh reformulation of sigmoid.

    w1_ref, b1_ref, w2_ref : SMEM (H,) f32   (already scaled by 1/2 in the wrapper)
    b2_ref                 : SMEM (1,) f32   (b2 + sum(w2)/2)
    x_ref, o_ref           : VMEM (block_rows, 128) f32 lane-dense batch tile

    out = b2' + sum_j w2'_j * tanh(w1'_j * x + b1'_j)
    """
    H = w1_ref.shape[0]                     # static (32)
    n_slabs = x_ref.shape[0] // SLAB        # static

    def slab_body(r, carry):
        start = pl.multiple_of(r * SLAB, SLAB)
        x = x_ref[pl.ds(start, SLAB), :]    # 4 vregs, held across the whole H loop

        def hidden(j, acc):
            # layer-1 scalar broadcast FMA (VPU) -> tanh (single EUP push)
            # -> layer-2 scalar FMA accumulate (VPU)
            return acc + w2_ref[j] * jnp.tanh(w1_ref[j] * x + b1_ref[j])

        acc = jnp.full_like(x, b2_ref[0])                       # output bias folded in
        acc = lax.fori_loop(0, H, hidden, acc, unroll=True)     # H=32, fully unrolled
        o_ref[pl.ds(start, SLAB), :] = acc
        return carry

    lax.fori_loop(0, n_slabs, slab_body, 0)


def mlp_forward(x, w1, b1, w2, b2, *, max_block_rows=2048):
    """x: (B, 1); w1: (H, 1); b1: (H,); w2: (1, H); b2: (1,)  (PyTorch nn.Linear layout)."""
    B = x.shape[0]
    H = w1.shape[0]
    orig_dtype = x.dtype

    # ---- tile geometry: batch mapped onto the 128-wide lane axis ------------
    rows = -(-B // LANES)                            # ceil(B / 128)
    rows_aligned = -(-rows // SLAB) * SLAB           # multiple of SLAB (sublane-aligned)
    # Keep >= ~4 grid steps when the batch permits (v7x megacore split), but
    # never below one SLAB and never above the VMEM-friendly cap.
    target = max(SLAB, min(max_block_rows, -(-rows_aligned // 4)))
    target = -(-target // SLAB) * SLAB
    block_rows = min(target, rows_aligned)
    rows_padded = -(-rows_aligned // block_rows) * block_rows
    b_padded = rows_padded * LANES

    # ---- layout glue: pad only when actually needed --------------------------
    x_flat = x.reshape(-1).astype(jnp.float32)
    if b_padded != B:
        x_flat = jnp.pad(x_flat, (0, b_padded - B))
    x_lanes = x_flat.reshape(rows_padded, LANES)

    # ---- parameter prep: fold sigmoid->tanh identity into the scalars --------
    #   sigmoid(t) = 0.5 * (1 + tanh(t/2))  =>
    #   out = (b2 + 0.5*sum(w2)) + sum_j (0.5*w2_j) * tanh(0.5*w1_j*x + 0.5*b1_j)
    w1_s = (0.5 * w1.reshape(H)).astype(jnp.float32)
    b1_s = (0.5 * b1.reshape(H)).astype(jnp.float32)
    w2_s = (0.5 * w2.reshape(H)).astype(jnp.float32)
    b2_s = (b2.reshape(1) + 0.5 * jnp.sum(w2)).astype(jnp.float32)

    grid = (rows_padded // block_rows,)
    smem_spec = pl.BlockSpec(memory_space=pltpu.MemorySpace.SMEM)
    lane_spec = pl.BlockSpec((block_rows, LANES), lambda i: (i, 0))

    out = pl.pallas_call(
        mlp_kernel,
        out_shape=jax.ShapeDtypeStruct((rows_padded, LANES), jnp.float32),
        grid=grid,
        in_specs=[smem_spec, smem_spec, smem_spec, smem_spec, lane_spec],
        out_specs=lane_spec,
        compiler_params=pltpu.CompilerParams(
            dimension_semantics=("parallel",),       # shard batch tiles across TCs (v7x)
            vmem_limit_bytes=32 * 1024 * 1024,       # tiles <= 1 MiB; explicit cap
        ),
    )(w1_s, b1_s, w2_s, b2_s, x_lanes)

    # Trim zero-padded tail lanes (only if padding was added) and restore (B, 1).
    out_flat = out.reshape(-1)
    if b_padded != B:
        out_flat = out_flat[:B]
    return out_flat.reshape(B, 1).astype(orig_dtype)


def init_params(key, hidden_dim):
    """Deterministic init mimicking nn.Linear's U(-1/sqrt(fan_in), 1/sqrt(fan_in))."""
    k1, k2, k3, k4 = jax.random.split(key, 4)
    bound1 = 1.0 / jnp.sqrt(1.0)            # fan_in of linear1 = 1
    bound2 = 1.0 / jnp.sqrt(hidden_dim)     # fan_in of linear2 = hidden_dim
    w1 = jax.random.uniform(k1, (hidden_dim, 1), jnp.float32, -bound1, bound1)
    b1 = jax.random.uniform(k2, (hidden_dim,), jnp.float32, -bound1, bound1)
    w2 = jax.random.uniform(k3, (1, hidden_dim), jnp.float32, -bound2, bound2)
    b2 = jax.random.uniform(k4, (1,), jnp.float32, -bound2, bound2)
    return w1, b1, w2, b2


if __name__ == "__main__":
    key = jax.random.PRNGKey(0)
    hidden_dim = 32
    batch = 8

    kx, kp = jax.random.split(key)
    x = jax.random.normal(kx, (batch, 1), jnp.float32)
    w1, b1, w2, b2 = init_params(kp, hidden_dim)

    out = mlp_forward(x, w1, b1, w2, b2)
    jax.block_until_ready(out)

    # Reference in plain JAX (same math as the PyTorch forward).
    y_ref = jax.nn.sigmoid(x @ w1.T + b1) @ w2.T + b2
    assert out.shape == (batch, 1)
    # tanh reformulation is exact-precision (no approx reciprocal), so tolerance
    # can be much tighter than the previous 5e-3.
    assert jnp.allclose(out, y_ref, atol=1e-4, rtol=1e-4)

    print("KERNEL_OK")
</pallas_src>

<mosaic_0001>
module attributes {stable_mosaic.version = 11 : i64} {
  func.func @mlp_kernel(%arg0: i32, %arg1: memref<32xf32, #tpu.memory_space<smem>>, %arg2: memref<32xf32, #tpu.memory_space<smem>>, %arg3: memref<32xf32, #tpu.memory_space<smem>>, %arg4: memref<1xf32, #tpu.memory_space<smem>>, %arg5: memref<32x128xf32, #tpu.memory_space<vmem>>, %arg6: memref<32x128xf32, #tpu.memory_space<vmem>>) attributes {dimension_semantics = [#tpu.dimension_semantics<parallel>], iteration_bounds = array<i64: 1>, scalar_prefetch = 0 : i64, scratch_operands = 0 : i64, tpu.core_type = #tpu.core_type<tc>, window_params = [{transform_indices = @transform_0, window_bounds = array<i64: 32>}, {transform_indices = @transform_1, window_bounds = array<i64: 32>}, {transform_indices = @transform_2, window_bounds = array<i64: 32>}, {transform_indices = @transform_3, window_bounds = array<i64: 1>}, {transform_indices = @transform_4, window_bounds = array<i64: 32, 128>}, {transform_indices = @transform_5, window_bounds = array<i64: 32, 128>}]} {
    %c0_i32 = arith.constant 0 : i32
    %c32_i32 = arith.constant 32 : i32
    %0 = arith.muli %c0_i32, %c32_i32 : i32
    %1 = tpu.assume_multiple %0, 32 : i32
    %2 = arith.index_cast %1 : i32 to index
    %c0 = arith.constant 0 : index
    %3 = vector.load %arg5[%2, %c0] : memref<32x128xf32, #tpu.memory_space<vmem>>, vector<32x128xf32>
    %c0_0 = arith.constant 0 : index
    %4 = memref.load %arg4[%c0_0] : memref<1xf32, #tpu.memory_space<smem>>
    %5 = vector.broadcast %4 : f32 to vector<32x128xf32>
    %c0_i32_1 = arith.constant 0 : i32
    %6 = arith.index_cast %c0_i32_1 : i32 to index
    %7 = memref.load %arg3[%6] : memref<32xf32, #tpu.memory_space<smem>>
    %8 = arith.index_cast %c0_i32_1 : i32 to index
    %9 = memref.load %arg1[%8] : memref<32xf32, #tpu.memory_space<smem>>
    %10 = vector.broadcast %9 : f32 to vector<32x128xf32>
    %11 = arith.mulf %10, %3 : vector<32x128xf32>
    %12 = arith.index_cast %c0_i32_1 : i32 to index
    %13 = memref.load %arg2[%12] : memref<32xf32, #tpu.memory_space<smem>>
    %14 = vector.broadcast %13 : f32 to vector<32x128xf32>
    %15 = arith.addf %11, %14 : vector<32x128xf32>
    %16 = math.tanh %15 : vector<32x128xf32>
    %17 = vector.broadcast %7 : f32 to vector<32x128xf32>
    %18 = arith.mulf %17, %16 : vector<32x128xf32>
    %19 = arith.addf %5, %18 : vector<32x128xf32>
    %c1_i32 = arith.constant 1 : i32
    %20 = arith.index_cast %c1_i32 : i32 to index
    %21 = memref.load %arg3[%20] : memref<32xf32, #tpu.memory_space<smem>>
    %22 = arith.index_cast %c1_i32 : i32 to index
    %23 = memref.load %arg1[%22] : memref<32xf32, #tpu.memory_space<smem>>
    %24 = vector.broadcast %23 : f32 to vector<32x128xf32>
    %25 = arith.mulf %24, %3 : vector<32x128xf32>
    %26 = arith.index_cast %c1_i32 : i32 to index
    %27 = memref.load %arg2[%26] : memref<32xf32, #tpu.memory_space<smem>>
    %28 = vector.broadcast %27 : f32 to vector<32x128xf32>
    %29 = arith.addf %25, %28 : vector<32x128xf32>
    %30 = math.tanh %29 : vector<32x128xf32>
    %31 = vector.broadcast %21 : f32 to vector<32x128xf32>
    %32 = arith.mulf %31, %30 : vector<32x128xf32>
    %33 = arith.addf %19, %32 : vector<32x128xf32>
    %c2_i32 = arith.constant 2 : i32
    %34 = arith.index_cast %c2_i32 : i32 to index
    %35 = memref.load %arg3[%34] : memref<32xf32, #tpu.memory_space<smem>>
    %36 = arith.index_cast %c2_i32 : i32 to index
    %37 = memref.load %arg1[%36] : memref<32xf32, #tpu.memory_space<smem>>
    %38 = vector.broadcast %37 : f32 to vector<32x128xf32>
    %39 = arith.mulf %38, %3 : vector<32x128xf32>
    %40 = arith.index_cast %c2_i32 : i32 to index
    %41 = memref.load %arg2[%40] : memref<32xf32, #tpu.memory_space<smem>>
    %42 = vector.broadcast %41 : f32 to vector<32x128xf32>
    %43 = arith.addf %39, %42 : vector<32x128xf32>
    %44 = math.tanh %43 : vector<32x128xf32>
    %45 = vector.broadcast %35 : f32 to vector<32x128xf32>
    %46 = arith.mulf %45, %44 : vector<32x128xf32>
    %47 = arith.addf %33, %46 : vector<32x128xf32>
    %c3_i32 = arith.constant 3 : i32
    %48 = arith.index_cast %c3_i32 : i32 to index
    %49 = memref.load %arg3[%48] : memref<32xf32, #tpu.memory_space<smem>>
    %50 = arith.index_cast %c3_i32 : i32 to index
    %51 = memref.load %arg1[%50] : memref<32xf32, #tpu.memory_space<smem>>
    %52 = vector.broadcast %51 : f32 to vector<32x128xf32>
    %53 = arith.mulf %52, %3 : vector<32x128xf32>
    %54 = arith.index_cast %c3_i32 : i32 to index
    %55 = memref.load %arg2[%54] : memref<32xf32, #tpu.memory_space<smem>>
    %56 = vector.broadcast %55 : f32 to vector<32x128xf32>
    %57 = arith.addf %53, %56 : vector<32x128xf32>
    %58 = math.tanh %57 : vector<32x128xf32>
    %59 = vector.broadcast %49 : f32 to vector<32x128xf32>
    %60 = arith.mulf %59, %58 : vector<32x128xf32>
    %61 = arith.addf %47, %60 : vector<32x128xf32>
    %c4_i32 = arith.constant 4 : i32
    %62 = arith.index_cast %c4_i32 : i32 to index
    %63 = memref.load %arg3[%62] : memref<32xf32, #tpu.memory_space<smem>>
    %64 = arith.index_cast %c4_i32 : i32 to index
    %65 = memref.load %arg1[%64] : memref<32xf32, #tpu.memory_space<smem>>
    %66 = vector.broadcast %65 : f32 to vector<32x128xf32>
    %67 = arith.mulf %66, %3 : vector<32x128xf32>
    %68 = arith.index_cast %c4_i32 : i32 to index
    %69 = memref.load %arg2[%68] : memref<32xf32, #tpu.memory_space<smem>>
    %70 = vector.broadcast %69 : f32 to vector<32x128xf32>
    %71 = arith.addf %67, %70 : vector<32x128xf32>
    %72 = math.tanh %71 : vector<32x128xf32>
    %73 = vector.broadcast %63 : f32 to vector<32x128xf32>
    %74 = arith.mulf %73, %72 : vector<32x128xf32>
    %75 = arith.addf %61, %74 : vector<32x128xf32>
    %c5_i32 = arith.constant 5 : i32
    %76 = arith.index_cast %c5_i32 : i32 to index
    %77 = memref.load %arg3[%76] : memref<32xf32, #tpu.memory_space<smem>>
    %78 = arith.index_cast %c5_i32 : i32 to index
    %79 = memref.load %arg1[%78] : memref<32xf32, #tpu.memory_space<smem>>
    %80 = vector.broadcast %79 : f32 to vector<32x128xf32>
    %81 = arith.mulf %80, %3 : vector<32x128xf32>
    %82 = arith.index_cast %c5_i32 : i32 to index
    %83 = memref.load %arg2[%82] : memref<32xf32, #tpu.memory_space<smem>>
    %84 = vector.broadcast %83 : f32 to vector<32x128xf32>
    %85 = arith.addf %81, %84 : vector<32x128xf32>
    %86 = math.tanh %85 : vector<32x128xf32>
    %87 = vector.broadcast %77 : f32 to vector<32x128xf32>
    %88 = arith.mulf %87, %86 : vector<32x128xf32>
    %89 = arith.addf %75, %88 : vector<32x128xf32>
    %c6_i32 = arith.constant 6 : i32
    %90 = arith.index_cast %c6_i32 : i32 to index
    %91 = memref.load %arg3[%90] : memref<32xf32, #tpu.memory_space<smem>>
    %92 = arith.index_cast %c6_i32 : i32 to index
    %93 = memref.load %arg1[%92] : memref<32xf32, #tpu.memory_space<smem>>
    %94 = vector.broadcast %93 : f32 to vector<32x128xf32>
    %95 = arith.mulf %94, %3 : vector<32x128xf32>
    %96 = arith.index_cast %c6_i32 : i32 to index
    %97 = memref.load %arg2[%96] : memref<32xf32, #tpu.memory_space<smem>>
    %98 = vector.broadcast %97 : f32 to vector<32x128xf32>
    %99 = arith.addf %95, %98 : vector<32x128xf32>
    %100 = math.tanh %99 : vector<32x128xf32>
    %101 = vector.broadcast %91 : f32 to vector<32x128xf32>
    %102 = arith.mulf %101, %100 : vector<32x128xf32>
    %103 = arith.addf %89, %102 : vector<32x128xf32>
    %c7_i32 = arith.constant 7 : i32
    %104 = arith.index_cast %c7_i32 : i32 to index
    %105 = memref.load %arg3[%104] : memref<32xf32, #tpu.memory_space<smem>>
    %106 = arith.index_cast %c7_i32 : i32 to index
    %107 = memref.load %arg1[%106] : memref<32xf32, #tpu.memory_space<smem>>
    %108 = vector.broadcast %107 : f32 to vector<32x128xf32>
    %109 = arith.mulf %108, %3 : vector<32x128xf32>
    %110 = arith.index_cast %c7_i32 : i32 to index
    %111 = memref.load %arg2[%110] : memref<32xf32, #tpu.memory_space<smem>>
    %112 = vector.broadcast %111 : f32 to vector<32x128xf32>
    %113 = arith.addf %109, %112 : vector<32x128xf32>
    %114 = math.tanh %113 : vector<32x128xf32>
    %115 = vector.broadcast %105 : f32 to vector<32x128xf32>
    %116 = arith.mulf %115, %114 : vector<32x128xf32>
    %117 = arith.addf %103, %116 : vector<32x128xf32>
    %c8_i32 = arith.constant 8 : i32
    %118 = arith.index_cast %c8_i32 : i32 to index
    %119 = memref.load %arg3[%118] : memref<32xf32, #tpu.memory_space<smem>>
    %120 = arith.index_cast %c8_i32 : i32 to index
    %121 = memref.load %arg1[%120] : memref<32xf32, #tpu.memory_space<smem>>
    %122 = vector.broadcast %121 : f32 to vector<32x128xf32>
    %123 = arith.mulf %122, %3 : vector<32x128xf32>
    %124 = arith.index_cast %c8_i32 : i32 to index
    %125 = memref.load %arg2[%124] : memref<32xf32, #tpu.memory_space<smem>>
    %126 = vector.broadcast %125 : f32 to vector<32x128xf32>
    %127 = arith.addf %123, %126 : vector<32x128xf32>
    %128 = math.tanh %127 : vector<32x128xf32>
    %129 = vector.broadcast %119 : f32 to vector<32x128xf32>
    %130 = arith.mulf %129, %128 : vector<32x128xf32>
    %131 = arith.addf %117, %130 : vector<32x128xf32>
    %c9_i32 = arith.constant 9 : i32
    %132 = arith.index_cast %c9_i32 : i32 to index
    %133 = memref.load %arg3[%132] : memref<32xf32, #tpu.memory_space<smem>>
    %134 = arith.index_cast %c9_i32 : i32 to index
    %135 = memref.load %arg1[%134] : memref<32xf32, #tpu.memory_space<smem>>
    %136 = vector.broadcast %135 : f32 to vector<32x128xf32>
    %137 = arith.mulf %136, %3 : vector<32x128xf32>
    %138 = arith.index_cast %c9_i32 : i32 to index
    %139 = memref.load %arg2[%138] : memref<32xf32, #tpu.memory_space<smem>>
    %140 = vector.broadcast %139 : f32 to vector<32x128xf32>
    %141 = arith.addf %137, %140 : vector<32x128xf32>
    %142 = math.tanh %141 : vector<32x128xf32>
    %143 = vector.broadcast %133 : f32 to vector<32x128xf32>
    %144 = arith.mulf %143, %142 : vector<32x128xf32>
    %145 = arith.addf %131, %144 : vector<32x128xf32>
    %c10_i32 = arith.constant 10 : i32
    %146 = arith.index_cast %c10_i32 : i32 to index
    %147 = memref.load %arg3[%146] : memref<32xf32, #tpu.memory_space<smem>>
    %148 = arith.index_cast %c10_i32 : i32 to index
    %149 = memref.load %arg1[%148] : memref<32xf32, #tpu.memory_space<smem>>
    %150 = vector.broadcast %149 : f32 to vector<32x128xf32>
    %151 = arith.mulf %150, %3 : vector<32x128xf32>
    %152 = arith.index_cast %c10_i32 : i32 to index
    %153 = memref.load %arg2[%152] : memref<32xf32, #tpu.memory_space<smem>>
    %154 = vector.broadcast %153 : f32 to vector<32x128xf32>
    %155 = arith.addf %151, %154 : vector<32x128xf32>
    %156 = math.tanh %155 : vector<32x128xf32>
    %157 = vector.broadcast %147 : f32 to vector<32x128xf32>
    %158 = arith.mulf %157, %156 : vector<32x128xf32>
    %159 = arith.addf %145, %158 : vector<32x128xf32>
    %c11_i32 = arith.constant 11 : i32
    %160 = arith.index_cast %c11_i32 : i32 to index
    %161 = memref.load %arg3[%160] : memref<32xf32, #tpu.memory_space<smem>>
    %162 = arith.index_cast %c11_i32 : i32 to index
    %163 = memref.load %arg1[%162] : memref<32xf32, #tpu.memory_space<smem>>
    %164 = vector.broadcast %163 : f32 to vector<32x128xf32>
    %165 = arith.mulf %164, %3 : vector<32x128xf32>
    %166 = arith.index_cast %c11_i32 : i32 to index
    %167 = memref.load %arg2[%166] : memref<32xf32, #tpu.memory_space<smem>>
    %168 = vector.broadcast %167 : f32 to vector<32x128xf32>
    %169 = arith.addf %165, %168 : vector<32x128xf32>
    %170 = math.tanh %169 : vector<32x128xf32>
    %171 = vector.broadcast %161 : f32 to vector<32x128xf32>
    %172 = arith.mulf %171, %170 : vector<32x128xf32>
    %173 = arith.addf %159, %172 : vector<32x128xf32>
    %c12_i32 = arith.constant 12 : i32
    %174 = arith.index_cast %c12_i32 : i32 to index
    %175 = memref.load %arg3[%174] : memref<32xf32, #tpu.memory_space<smem>>
    %176 = arith.index_cast %c12_i32 : i32 to index
    %177 = memref.load %arg1[%176] : memref<32xf32, #tpu.memory_space<smem>>
    %178 = vector.broadcast %177 : f32 to vector<32x128xf32>
    %179 = arith.mulf %178, %3 : vector<32x128xf32>
    %180 = arith.index_cast %c12_i32 : i32 to index
    %181 = memref.load %arg2[%180] : memref<32xf32, #tpu.memory_space<smem>>
    %182 = vector.broadcast %181 : f32 to vector<32x128xf32>
    %183 = arith.addf %179, %182 : vector<32x128xf32>
    %184 = math.tanh %183 : vector<32x128xf32>
    %185 = vector.broadcast %175 : f32 to vector<32x128xf32>
    %186 = arith.mulf %185, %184 : vector<32x128xf32>
    %187 = arith.addf %173, %186 : vector<32x128xf32>
    %c13_i32 = arith.constant 13 : i32
    %188 = arith.index_cast %c13_i32 : i32 to index
    %189 = memref.load %arg3[%188] : memref<32xf32, #tpu.memory_space<smem>>
    %190 = arith.index_cast %c13_i32 : i32 to index
    %191 = memref.load %arg1[%190] : memref<32xf32, #tpu.memory_space<smem>>
    %192 = vector.broadcast %191 : f32 to vector<32x128xf32>
    %193 = arith.mulf %192, %3 : vector<32x128xf32>
    %194 = arith.index_cast %c13_i32 : i32 to index
    %195 = memref.load %arg2[%194] : memref<32xf32, #tpu.memory_space<smem>>
    %196 = vector.broadcast %195 : f32 to vector<32x128xf32>
    %197 = arith.addf %193, %196 : vector<32x128xf32>
    %198 = math.tanh %197 : vector<32x128xf32>
    %199 = vector.broadcast %189 : f32 to vector<32x128xf32>
    %200 = arith.mulf %199, %198 : vector<32x128xf32>
    %201 = arith.addf %187, %200 : vector<32x128xf32>
    %c14_i32 = arith.constant 14 : i32
    %202 = arith.index_cast %c14_i32 : i32 to index
    %203 = memref.load %arg3[%202] : memref<32xf32, #tpu.memory_space<smem>>
    %204 = arith.index_cast %c14_i32 : i32 to index
    %205 = memref.load %arg1[%204] : memref<32xf32, #tpu.memory_space<smem>>
    %206 = vector.broadcast %205 : f32 to vector<32x128xf32>
    %207 = arith.mulf %206, %3 : vector<32x128xf32>
    %208 = arith.index_cast %c14_i32 : i32 to index
    %209 = memref.load %arg2[%208] : memref<32xf32, #tpu.memory_space<smem>>
    %210 = vector.broadcast %209 : f32 to vector<32x128xf32>
    %211 = arith.addf %207, %210 : vector<32x128xf32>
    %212 = math.tanh %211 : vector<32x128xf32>
    %213 = vector.broadcast %203 : f32 to vector<32x128xf32>
    %214 = arith.mulf %213, %212 : vector<32x128xf32>
    %215 = arith.addf %201, %214 : vector<32x128xf32>
    %c15_i32 = arith.constant 15 : i32
    %216 = arith.index_cast %c15_i32 : i32 to index
    %217 = memref.load %arg3[%216] : memref<32xf32, #tpu.memory_space<smem>>
    %218 = arith.index_cast %c15_i32 : i32 to index
    %219 = memref.load %arg1[%218] : memref<32xf32, #tpu.memory_space<smem>>
    %220 = vector.broadcast %219 : f32 to vector<32x128xf32>
    %221 = arith.mulf %220, %3 : vector<32x128xf32>
    %222 = arith.index_cast %c15_i32 : i32 to index
    %223 = memref.load %arg2[%222] : memref<32xf32, #tpu.memory_space<smem>>
    %224 = vector.broadcast %223 : f32 to vector<32x128xf32>
    %225 = arith.addf %221, %224 : vector<32x128xf32>
    %226 = math.tanh %225 : vector<32x128xf32>
    %227 = vector.broadcast %217 : f32 to vector<32x128xf32>
    %228 = arith.mulf %227, %226 : vector<32x128xf32>
    %229 = arith.addf %215, %228 : vector<32x128xf32>
    %c16_i32 = arith.constant 16 : i32
    %230 = arith.index_cast %c16_i32 : i32 to index
    %231 = memref.load %arg3[%230] : memref<32xf32, #tpu.memory_space<smem>>
    %232 = arith.index_cast %c16_i32 : i32 to index
    %233 = memref.load %arg1[%232] : memref<32xf32, #tpu.memory_space<smem>>
    %234 = vector.broadcast %233 : f32 to vector<32x128xf32>
    %235 = arith.mulf %234, %3 : vector<32x128xf32>
    %236 = arith.index_cast %c16_i32 : i32 to index
    %237 = memref.load %arg2[%236] : memref<32xf32, #tpu.memory_space<smem>>
    %238 = vector.broadcast %237 : f32 to vector<32x128xf32>
    %239 = arith.addf %235, %238 : vector<32x128xf32>
    %240 = math.tanh %239 : vector<32x128xf32>
    %241 = vector.broadcast %231 : f32 to vector<32x128xf32>
    %242 = arith.mulf %241, %240 : vector<32x128xf32>
    %243 = arith.addf %229, %242 : vector<32x128xf32>
    %c17_i32 = arith.constant 17 : i32
    %244 = arith.index_cast %c17_i32 : i32 to index
    %245 = memref.load %arg3[%244] : memref<32xf32, #tpu.memory_space<smem>>
    %246 = arith.index_cast %c17_i32 : i32 to index
    %247 = memref.load %arg1[%246] : memref<32xf32, #tpu.memory_space<smem>>
    %248 = vector.broadcast %247 : f32 to vector<32x128xf32>
    %249 = arith.mulf %248, %3 : vector<32x128xf32>
    %250 = arith.index_cast %c17_i32 : i32 to index
    %251 = memref.load %arg2[%250] : memref<32xf32, #tpu.memory_space<smem>>
    %252 = vector.broadcast %251 : f32 to vector<32x128xf32>
    %253 = arith.addf %249, %252 : vector<32x128xf32>
    %254 = math.tanh %253 : vector<32x128xf32>
    %255 = vector.broadcast %245 : f32 to vector<32x128xf32>
    %256 = arith.mulf %255, %254 : vector<32x128xf32>
    %257 = arith.addf %243, %256 : vector<32x128xf32>
    %c18_i32 = arith.constant 18 : i32
    %258 = arith.index_cast %c18_i32 : i32 to index
    %259 = memref.load %arg3[%258] : memref<32xf32, #tpu.memory_space<smem>>
    %260 = arith.index_cast %c18_i32 : i32 to index
    %261 = memref.load %arg1[%260] : memref<32xf32, #tpu.memory_space<smem>>
    %262 = vector.broadcast %261 : f32 to vector<32x128xf32>
    %263 = arith.mulf %262, %3 : vector<32x128xf32>
    %264 = arith.index_cast %c18_i32 : i32 to index
    %265 = memref.load %arg2[%264] : memref<32xf32, #tpu.memory_space<smem>>
    %266 = vector.broadcast %265 : f32 to vector<32x128xf32>
    %267 = arith.addf %263, %266 : vector<32x128xf32>
    %268 = math.tanh %267 : vector<32x128xf32>
    %269 = vector.broadcast %259 : f32 to vector<32x128xf32>
    %270 = arith.mulf %269, %268 : vector<32x128xf32>
    %271 = arith.addf %257, %270 : vector<32x128xf32>
    %c19_i32 = arith.constant 19 : i32
    %272 = arith.index_cast %c19_i32 : i32 to index
    %273 = memref.load %arg3[%272] : memref<32xf32, #tpu.memory_space<smem>>
    %274 = arith.index_cast %c19_i32 : i32 to index
    %275 = memref.load %arg1[%274] : memref<32xf32, #tpu.memory_space<smem>>
    %276 = vector.broadcast %275 : f32 to vector<32x128xf32>
    %277 = arith.mulf %276, %3 : vector<32x128xf32>
    %278 = arith.index_cast %c19_i32 : i32 to index
    %279 = memref.load %arg2[%278] : memref<32xf32, #tpu.memory_space<smem>>
    %280 = vector.broadcast %279 : f32 to vector<32x128xf32>
    %281 = arith.addf %277, %280 : vector<32x128xf32>
    %282 = math.tanh %281 : vector<32x128xf32>
    %283 = vector.broadcast %273 : f32 to vector<32x128xf32>
    %284 = arith.mulf %283, %282 : vector<32x128xf32>
    %285 = arith.addf %271, %284 : vector<32x128xf32>
    %c20_i32 = arith.constant 20 : i32
    %286 = arith.index_cast %c20_i32 : i32 to index
    %287 = memref.load %arg3[%286] : memref<32xf32, #tpu.memory_space<smem>>
    %288 = arith.index_cast %c20_i32 : i32 to index
    %289 = memref.load %arg1[%288] : memref<32xf32, #tpu.memory_space<smem>>
    %290 = vector.broadcast %289 : f32 to vector<32x128xf32>
    %291 = arith.mulf %290, %3 : vector<32x128xf32>
    %292 = arith.index_cast %c20_i32 : i32 to index
    %293 = memref.load %arg2[%292] : memref<32xf32, #tpu.memory_space<smem>>
    %294 = vector.broadcast %293 : f32 to vector<32x128xf32>
    %295 = arith.addf %291, %294 : vector<32x128xf32>
    %296 = math.tanh %295 : vector<32x128xf32>
    %297 = vector.broadcast %287 : f32 to vector<32x128xf32>
    %298 = arith.mulf %297, %296 : vector<32x128xf32>
    %299 = arith.addf %285, %298 : vector<32x128xf32>
    %c21_i32 = arith.constant 21 : i32
    %300 = arith.index_cast %c21_i32 : i32 to index
    %301 = memref.load %arg3[%300] : memref<32xf32, #tpu.memory_space<smem>>
    %302 = arith.index_cast %c21_i32 : i32 to index
    %303 = memref.load %arg1[%302] : memref<32xf32, #tpu.memory_space<smem>>
    %304 = vector.broadcast %303 : f32 to vector<32x128xf32>
    %305 = arith.mulf %304, %3 : vector<32x128xf32>
    %306 = arith.index_cast %c21_i32 : i32 to index
    %307 = memref.load %arg2[%306] : memref<32xf32, #tpu.memory_space<smem>>
    %308 = vector.broadcast %307 : f32 to vector<32x128xf32>
    %309 = arith.addf %305, %308 : vector<32x128xf32>
    %310 = math.tanh %309 : vector<32x128xf32>
    %311 = vector.broadcast %301 : f32 to vector<32x128xf32>
    %312 = arith.mulf %311, %310 : vector<32x128xf32>
    %313 = arith.addf %299, %312 : vector<32x128xf32>
    %c22_i32 = arith.constant 22 : i32
    %314 = arith.index_cast %c22_i32 : i32 to index
    %315 = memref.load %arg3[%314] : memref<32xf32, #tpu.memory_space<smem>>
    %316 = arith.index_cast %c22_i32 : i32 to index
    %317 = memref.load %arg1[%316] : memref<32xf32, #tpu.memory_space<smem>>
    %318 = vector.broadcast %317 : f32 to vector<32x128xf32>
    %319 = arith.mulf %318, %3 : vector<32x128xf32>
    %320 = arith.index_cast %c22_i32 : i32 to index
    %321 = memref.load %arg2[%320] : memref<32xf32, #tpu.memory_space<smem>>
    %322 = vector.broadcast %321 : f32 to vector<32x128xf32>
    %323 = arith.addf %319, %322 : vector<32x128xf32>
    %324 = math.tanh %323 : vector<32x128xf32>
    %325 = vector.broadcast %315 : f32 to vector<32x128xf32>
    %326 = arith.mulf %325, %324 : vector<32x128xf32>
    %327 = arith.addf %313, %326 : vector<32x128xf32>
    %c23_i32 = arith.constant 23 : i32
    %328 = arith.index_cast %c23_i32 : i32 to index
    %329 = memref.load %arg3[%328] : memref<32xf32, #tpu.memory_space<smem>>
    %330 = arith.index_cast %c23_i32 : i32 to index
    %331 = memref.load %arg1[%330] : memref<32xf32, #tpu.memory_space<smem>>
    %332 = vector.broadcast %331 : f32 to vector<32x128xf32>
    %333 = arith.mulf %332, %3 : vector<32x128xf32>
    %334 = arith.index_cast %c23_i32 : i32 to index
    %335 = memref.load %arg2[%334] : memref<32xf32, #tpu.memory_space<smem>>
    %336 = vector.broadcast %335 : f32 to vector<32x128xf32>
    %337 = arith.addf %333, %336 : vector<32x128xf32>
    %338 = math.tanh %337 : vector<32x128xf32>
    %339 = vector.broadcast %329 : f32 to vector<32x128xf32>
    %340 = arith.mulf %339, %338 : vector<32x128xf32>
    %341 = arith.addf %327, %340 : vector<32x128xf32>
    %c24_i32 = arith.constant 24 : i32
    %342 = arith.index_cast %c24_i32 : i32 to index
    %343 = memref.load %arg3[%342] : memref<32xf32, #tpu.memory_space<smem>>
    %344 = arith.index_cast %c24_i32 : i32 to index
    %345 = memref.load %arg1[%344] : memref<32xf32, #tpu.memory_space<smem>>
    %346 = vector.broadcast %345 : f32 to vector<32x128xf32>
    %347 = arith.mulf %346, %3 : vector<32x128xf32>
    %348 = arith.index_cast %c24_i32 : i32 to index
    %349 = memref.load %arg2[%348] : memref<32xf32, #tpu.memory_space<smem>>
    %350 = vector.broadcast %349 : f32 to vector<32x128xf32>
    %351 = arith.addf %347, %350 : vector<32x128xf32>
    %352 = math.tanh %351 : vector<32x128xf32>
    %353 = vector.broadcast %343 : f32 to vector<32x128xf32>
    %354 = arith.mulf %353, %352 : vector<32x128xf32>
    %355 = arith.addf %341, %354 : vector<32x128xf32>
    %c25_i32 = arith.constant 25 : i32
    %356 = arith.index_cast %c25_i32 : i32 to index
    %357 = memref.load %arg3[%356] : memref<32xf32, #tpu.memory_space<smem>>
    %358 = arith.index_cast %c25_i32 : i32 to index
    %359 = memref.load %arg1[%358] : memref<32xf32, #tpu.memory_space<smem>>
    %360 = vector.broadcast %359 : f32 to vector<32x128xf32>
    %361 = arith.mulf %360, %3 : vector<32x128xf32>
    %362 = arith.index_cast %c25_i32 : i32 to index
    %363 = memref.load %arg2[%362] : memref<32xf32, #tpu.memory_space<smem>>
    %364 = vector.broadcast %363 : f32 to vector<32x128xf32>
    %365 = arith.addf %361, %364 : vector<32x128xf32>
    %366 = math.tanh %365 : vector<32x128xf32>
    %367 = vector.broadcast %357 : f32 to vector<32x128xf32>
    %368 = arith.mulf %367, %366 : vector<32x128xf32>
    %369 = arith.addf %355, %368 : vector<32x128xf32>
    %c26_i32 = arith.constant 26 : i32
    %370 = arith.index_cast %c26_i32 : i32 to index
    %371 = memref.load %arg3[%370] : memref<32xf32, #tpu.memory_space<smem>>
    %372 = arith.index_cast %c26_i32 : i32 to index
    %373 = memref.load %arg1[%372] : memref<32xf32, #tpu.memory_space<smem>>
    %374 = vector.broadcast %373 : f32 to vector<32x128xf32>
    %375 = arith.mulf %374, %3 : vector<32x128xf32>
    %376 = arith.index_cast %c26_i32 : i32 to index
    %377 = memref.load %arg2[%376] : memref<32xf32, #tpu.memory_space<smem>>
    %378 = vector.broadcast %377 : f32 to vector<32x128xf32>
    %379 = arith.addf %375, %378 : vector<32x128xf32>
    %380 = math.tanh %379 : vector<32x128xf32>
    %381 = vector.broadcast %371 : f32 to vector<32x128xf32>
    %382 = arith.mulf %381, %380 : vector<32x128xf32>
    %383 = arith.addf %369, %382 : vector<32x128xf32>
    %c27_i32 = arith.constant 27 : i32
    %384 = arith.index_cast %c27_i32 : i32 to index
    %385 = memref.load %arg3[%384] : memref<32xf32, #tpu.memory_space<smem>>
    %386 = arith.index_cast %c27_i32 : i32 to index
    %387 = memref.load %arg1[%386] : memref<32xf32, #tpu.memory_space<smem>>
    %388 = vector.broadcast %387 : f32 to vector<32x128xf32>
    %389 = arith.mulf %388, %3 : vector<32x128xf32>
    %390 = arith.index_cast %c27_i32 : i32 to index
    %391 = memref.load %arg2[%390] : memref<32xf32, #tpu.memory_space<smem>>
    %392 = vector.broadcast %391 : f32 to vector<32x128xf32>
    %393 = arith.addf %389, %392 : vector<32x128xf32>
    %394 = math.tanh %393 : vector<32x128xf32>
    %395 = vector.broadcast %385 : f32 to vector<32x128xf32>
    %396 = arith.mulf %395, %394 : vector<32x128xf32>
    %397 = arith.addf %383, %396 : vector<32x128xf32>
    %c28_i32 = arith.constant 28 : i32
    %398 = arith.index_cast %c28_i32 : i32 to index
    %399 = memref.load %arg3[%398] : memref<32xf32, #tpu.memory_space<smem>>
    %400 = arith.index_cast %c28_i32 : i32 to index
    %401 = memref.load %arg1[%400] : memref<32xf32, #tpu.memory_space<smem>>
    %402 = vector.broadcast %401 : f32 to vector<32x128xf32>
    %403 = arith.mulf %402, %3 : vector<32x128xf32>
    %404 = arith.index_cast %c28_i32 : i32 to index
    %405 = memref.load %arg2[%404] : memref<32xf32, #tpu.memory_space<smem>>
    %406 = vector.broadcast %405 : f32 to vector<32x128xf32>
    %407 = arith.addf %403, %406 : vector<32x128xf32>
    %408 = math.tanh %407 : vector<32x128xf32>
    %409 = vector.broadcast %399 : f32 to vector<32x128xf32>
    %410 = arith.mulf %409, %408 : vector<32x128xf32>
    %411 = arith.addf %397, %410 : vector<32x128xf32>
    %c29_i32 = arith.constant 29 : i32
    %412 = arith.index_cast %c29_i32 : i32 to index
    %413 = memref.load %arg3[%412] : memref<32xf32, #tpu.memory_space<smem>>
    %414 = arith.index_cast %c29_i32 : i32 to index
    %415 = memref.load %arg1[%414] : memref<32xf32, #tpu.memory_space<smem>>
    %416 = vector.broadcast %415 : f32 to vector<32x128xf32>
    %417 = arith.mulf %416, %3 : vector<32x128xf32>
    %418 = arith.index_cast %c29_i32 : i32 to index
    %419 = memref.load %arg2[%418] : memref<32xf32, #tpu.memory_space<smem>>
    %420 = vector.broadcast %419 : f32 to vector<32x128xf32>
    %421 = arith.addf %417, %420 : vector<32x128xf32>
    %422 = math.tanh %421 : vector<32x128xf32>
    %423 = vector.broadcast %413 : f32 to vector<32x128xf32>
    %424 = arith.mulf %423, %422 : vector<32x128xf32>
    %425 = arith.addf %411, %424 : vector<32x128xf32>
    %c30_i32 = arith.constant 30 : i32
    %426 = arith.index_cast %c30_i32 : i32 to index
    %427 = memref.load %arg3[%426] : memref<32xf32, #tpu.memory_space<smem>>
    %428 = arith.index_cast %c30_i32 : i32 to index
    %429 = memref.load %arg1[%428] : memref<32xf32, #tpu.memory_space<smem>>
    %430 = vector.broadcast %429 : f32 to vector<32x128xf32>
    %431 = arith.mulf %430, %3 : vector<32x128xf32>
    %432 = arith.index_cast %c30_i32 : i32 to index
    %433 = memref.load %arg2[%432] : memref<32xf32, #tpu.memory_space<smem>>
    %434 = vector.broadcast %433 : f32 to vector<32x128xf32>
    %435 = arith.addf %431, %434 : vector<32x128xf32>
    %436 = math.tanh %435 : vector<32x128xf32>
    %437 = vector.broadcast %427 : f32 to vector<32x128xf32>
    %438 = arith.mulf %437, %436 : vector<32x128xf32>
    %439 = arith.addf %425, %438 : vector<32x128xf32>
    %c31_i32 = arith.constant 31 : i32
    %440 = arith.index_cast %c31_i32 : i32 to index
    %441 = memref.load %arg3[%440] : memref<32xf32, #tpu.memory_space<smem>>
    %442 = arith.index_cast %c31_i32 : i32 to index
    %443 = memref.load %arg1[%442] : memref<32xf32, #tpu.memory_space<smem>>
    %444 = vector.broadcast %443 : f32 to vector<32x128xf32>
    %445 = arith.mulf %444, %3 : vector<32x128xf32>
    %446 = arith.index_cast %c31_i32 : i32 to index
    %447 = memref.load %arg2[%446] : memref<32xf32, #tpu.memory_space<smem>>
    %448 = vector.broadcast %447 : f32 to vector<32x128xf32>
    %449 = arith.addf %445, %448 : vector<32x128xf32>
    %450 = math.tanh %449 : vector<32x128xf32>
    %451 = vector.broadcast %441 : f32 to vector<32x128xf32>
    %452 = arith.mulf %451, %450 : vector<32x128xf32>
    %453 = arith.addf %439, %452 : vector<32x128xf32>
    %c32_i32_2 = arith.constant 32 : i32
    %454 = arith.index_cast %1 : i32 to index
    %c0_3 = arith.constant 0 : index
    %455 = vector.load %arg6[%454, %c0_3] : memref<32x128xf32, #tpu.memory_space<vmem>>, vector<32x128xf32>
    tpu.vector_store %arg6[%454, %c0_3], %453 {strides = array<i32>} : memref<32x128xf32, #tpu.memory_space<vmem>>, vector<32x128xf32>,
    %c1_i32_4 = arith.constant 1 : i32
    return
  }
  func.func @transform_0(%arg0: i32) -> i32 {
    %c0_i32 = arith.constant 0 : i32
    %c0_i32_0 = arith.constant 0 : i32
    return %c0_i32 : i32
  }
  func.func @transform_1(%arg0: i32) -> i32 {
    %c0_i32 = arith.constant 0 : i32
    %c0_i32_0 = arith.constant 0 : i32
    return %c0_i32 : i32
  }
  func.func @transform_2(%arg0: i32) -> i32 {
    %c0_i32 = arith.constant 0 : i32
    %c0_i32_0 = arith.constant 0 : i32
    return %c0_i32 : i32
  }
  func.func @transform_3(%arg0: i32) -> i32 {
    %c0_i32 = arith.constant 0 : i32
    %c0_i32_0 = arith.constant 0 : i32
    return %c0_i32 : i32
  }
  func.func @transform_4(%arg0: i32) -> (i32, i32) {
    %c0_i32 = arith.constant 0 : i32
    %c0_i32_0 = arith.constant 0 : i32
    return %arg0, %c0_i32 : i32, i32
  }
  func.func @transform_5(%arg0: i32) -> (i32, i32) {
    %c0_i32 = arith.constant 0 : i32
    %c0_i32_0 = arith.constant 0 : i32
    return %arg0, %c0_i32 : i32, i32
  }
}

</mosaic_0001>

<bundles_post_ra>
// kernel: tpu_custom_call.1
= control target key start
LH: loop header
LB: loop body
LE: loop exit
PB: predicated region body
PF: predicated region fallthrough
CT: control target
= control target key end

     0   :  { %11 = vsyncpa [#allocation6], 0  ;;  %s1949_s0 = inlined_call_operand.vmem [shape: f32[32], index: 0, kind: input, shape index: {}]   ;;  %s1950_s1 = inlined_call_operand.vmem [shape: f32[32], index: 1, kind: input, shape index: {}]   ;;  %s1951_s2 = inlined_call_operand.vmem [shape: f32[32], index: 2, kind: input, shape index: {}]   ;;  %s1952_s3 = inlined_call_operand.<no memory space> [shape: f32[1], index: 3, kind: input, shape index: {}]   ;;  %s1953_s4 = inlined_call_operand.hbm [shape: f32[32,128], index: 4, kind: input, shape index: {}]   ;;  %s1954_s5 = inlined_call_operand.hbm [shape: f32[32,128], index: 5, kind: output, shape index: {}]  }
   0x1   :  { %12 = vsyncpa [#allocation8], 0 }
   0x2   :  { %13 = vsyncpa [#allocation4], 0  ;;  %s31_s20 = sshll.u32 %s1950_s1, 4  ;;  %s32_s20 = int_to_ptr.vmem [resolvable:$true] %s31_s20 }
   0x3   :  { %14 = vsyncpa [#allocation5], 0  ;;  %s21_s23 = sshll.u32 %s1949_s0, 4  ;;  %s1293_s24 = scalar_lea.vmem %s32_s20, 16  ;;  %s22_s23 = int_to_ptr.vmem [resolvable:$true] %s21_s23 }
   0x4   :  { %p1294_p0 = scmp.ne.s32.totalorder %s32_s20, %s1293_s24  ;;  %p1298_p1 = scmp.lt.s32.totalorder %s32_s20, %s32_s20 }
   0x5   :  { %p1299_p2 = scmp.lt.s32.totalorder %s1293_s24, %s1293_s24 }
   0x7   :  { %p1300_p3 = por %p1299_p2, %p1298_p1 }
   0x9   :  { %p1301_p4 = pnand %p1300_p3, %p1294_p0 }
   0xb   :  { %1304 = shalt.err (!%p1301_p4)
}
   0xc   :  { %s1381_s25 = smov [#allocation7]   ;;  %s1305_s26 = scalar_lea.vmem %s22_s23, 16 }
   0xd   :  { %34 = dma.vmem_to_smem %s32_s20, 16, %s1381_s25, [#allocation8]  }
   0xe   :  { %p1306_p5 = scmp.ne.s32.totalorder %s22_s23, %s1305_s26  ;;  %p1310_p6 = scmp.lt.s32.totalorder %s22_s23, %s22_s23 }
   0xf   :  { %p1311_p7 = scmp.lt.s32.totalorder %s1305_s26, %s1305_s26 }
  0x11   :  { %p1312_p8 = por %p1311_p7, %p1310_p6 }
  0x13   :  { %p1313_p9 = pnand %p1312_p8, %p1306_p5 }
  0x15   :  { %1316 = shalt.err (!%p1313_p9)
}
  0x16   :  { %s1382_s1 = smov [#allocation3]   ;;  %s41_s28 = sshll.u32 %s1951_s2, 4  ;;  %s42_s28 = int_to_ptr.vmem [resolvable:$true] %s41_s28 }
  0x17   :  { %24 = dma.vmem_to_smem %s22_s23, 16, %s1382_s1, [#allocation6]  }
  0x18   :  { %s1317_s29 = scalar_lea.vmem %s42_s28, 16  ;;  %p1322_p11 = scmp.lt.s32.totalorder %s42_s28, %s42_s28 }
  0x19   :  { %p1318_p10 = scmp.ne.s32.totalorder %s42_s28, %s1317_s29  ;;  %p1323_p12 = scmp.lt.s32.totalorder %s1317_s29, %s1317_s29 }
  0x1b   :  { %p1324_p13 = por %p1323_p12, %p1322_p11 }
  0x1d   :  { %p1325_p0 = pnand %p1324_p13, %p1318_p10 }
  0x1f   :  { %1328 = shalt.err (!%p1325_p0)
}
  0x20   :  { %s1383_s30 = smov [#allocation9]   ;;  %s1384_s6 = smov [#allocation10]  }
  0x21   :  { %44 = dma.vmem_to_smem %s42_s28, 16, %s1383_s30, [#allocation8]  }
  0x22   :  { %s52_s7 = sshll.u32 %s1384_s6, 4  ;;  %s1329_s10 = scalar_lea.hbm %s1953_s4, 512  ;;  %s53_s7 = int_to_ptr.vmem [resolvable:$true] %s52_s7 }
  0x23   :  { %p1330_p1 = scmp.ne.s32.totalorder %s1953_s4, %s1329_s10  ;;  %p1333_p2 = scmp.lt.u32.totalorder %s1329_s10, %s1953_s4 }
  0x25   :  { %p1335_p3 = pnand %p1333_p2, %p1330_p1 }
  0x27   :  { %1338 = shalt.err (!%p1335_p3)
}
  0x28   :  { %s1339_s14 = scalar_lea.vmem %s53_s7, 512  ;;  %p1344_p5 = scmp.lt.s32.totalorder %s53_s7, %s53_s7 }
  0x29   :  { %p1340_p4 = scmp.ne.s32.totalorder %s53_s7, %s1339_s14  ;;  %p1345_p6 = scmp.lt.s32.totalorder %s1339_s14, %s1339_s14 }
  0x2b   :  { %p1346_p7 = por %p1345_p6, %p1344_p5 }
  0x2d   :  { %p1347_p8 = pnand %p1346_p7, %p1340_p4 }
  0x2f   :  { %1350 = shalt.err (!%p1347_p8)
}
  0x30   :  { %s1385_s15 = smov 128   ;;  %s1386_s16 = smov 8  }
  0x31   :  { %58 = dma.hbm_to_vmem [thread:$0]  %s1953_s4, 512, %s53_s7, [#allocation4], %s1385_s15, %s1385_s15, %s1386_s16  }
  0x32   :  { %1373 = dma.done.wait [#allocation6], 16  }
  0x33   :  { %1374 = vsyncadd [#allocation6], 4294967280 }
  0x34   :  { %1375 = dma.done.wait [#allocation8], 32  }
  0x35   :  { %1376 = vsyncadd [#allocation8], 4294967264 }
  0x36   :  { %1377 = dma.done.wait [#allocation4], 512  }
  0x37   :  { %1378 = vsyncadd [#allocation4], 4294966784 }
  0x38   :  { %71 = sfence }
  0x39   :  { %s78_s19 = sld [smem:[#allocation9]]  ;;  %s934_s22 = sld [smem:[#allocation3 + $0x1]]  ;;  %v1442_v0 = vld [vmem:[#allocation10] sm:$0xff]  ;;  %v1444_v1 = vld [vmem:[#allocation10 + $0x8] sm:$0xff]  ;;  %v1446_v2 = vld [vmem:[#allocation10 + $0x10] sm:$0xff]  ;;  %v1459_v10 = vstv %s1952_s3 }
  0x3a   :  { %s79_s20 = sld [smem:[#allocation3]]  ;;  %s935_s23 = sld [smem:[#allocation7 + $0x1]]  ;;  %v1448_v3 = vld [vmem:[#allocation10 + $0x18] sm:$0xff] }
  0x3b   :  { %s85_s21 = sld [smem:[#allocation7]]  ;;  %s937_s24 = sld [smem:[#allocation3 + $0x2]] }
  0x3c   :  { %s938_s25 = sld [smem:[#allocation7 + $0x2]]  ;;  %s940_s4 = sld [smem:[#allocation3 + $0x3]] }
  0x3d   :  { %s1454_s26 = sld [smem:[#allocation9 + $0x1]]  ;;  %s1463_s27 = sld [smem:[#allocation9 + $0x2]] }
  0x3e   :  { %s1465_s28 = sld [smem:[#allocation7 + $0x3]]  ;;  %s1473_s29 = sld [smem:[#allocation3 + $0x4]] }
  0x3f   :  { %v1461_v11 = vstv %s78_s19  ;;  %v106_v12 = vstv %s934_s22  ;;  %s1471_s3 = sld [smem:[#allocation9 + $0x3]]  ;;  %s1475_s30 = sld [smem:[#allocation7 + $0x4]] }
  0x40   :  { %v80_v4 = vstv %s79_s20  ;;  %v112_v13 = vstv %s935_s23  ;;  %v107_v18 = vmul.f32 %v106_v12, %v1442_v0  ;;  %v108_v19 = vmul.f32 %v106_v12, %v1444_v1  ;;  %s1482_s6 = sld [smem:[#allocation3 + $0x5]]  ;;  %s1508_s8 = sld [smem:[#allocation9 + $0x4]] }
  0x41   :  { %v86_v5 = vstv %s85_s21  ;;  %v81_v6 = vmul.f32 %v80_v4, %v1442_v0  ;;  %v82_v7 = vmul.f32 %v80_v4, %v1444_v1  ;;  %v83_v8 = vmul.f32 %v80_v4, %v1446_v2  ;;  %s1502_s7 = sld [smem:[#allocation7 + $0x5]]  ;;  %s1515_s9 = sld [smem:[#allocation3 + $0x6]] }
  0x42   :  { %v84_v9 = vmul.f32 %v80_v4, %v1448_v3  ;;  %v109_v20 = vmul.f32 %v106_v12, %v1446_v2  ;;  %v110_v21 = vmul.f32 %v106_v12, %v1448_v3  ;;  %v132_v22 = vstv %s937_s24  ;;  %s1521_s10 = sld [smem:[#allocation9 + $0x5]]  ;;  %s1529_s11 = sld [smem:[#allocation7 + $0x6]] }
  0x43   :  { %v87_v14 = vadd.f32 %v86_v5, %v81_v6  ;;  %v88_v15 = vadd.f32 %v86_v5, %v82_v7  ;;  %v89_v16 = vadd.f32 %v86_v5, %v83_v8  ;;  %v138_v23 = vstv %s938_s25  ;;  %s1534_s12 = sld [smem:[#allocation9 + $0x6]]  ;;  %s1537_s2 = sld [smem:[#allocation3 + $0x7]] }
  0x44   :  { %v90_v17 = vadd.f32 %v86_v5, %v84_v9  ;;  %v158_v24 = vstv %s940_s4  ;;  %v113_v25 = vadd.f32 %v112_v13, %v107_v18  ;;  %v114_v26 = vadd.f32 %v112_v13, %v108_v19  ;;  %s1549_s13 = sld [smem:[#allocation7 + $0x7]]  ;;  %s1551_s14 = sld [smem:[#allocation3 + $0x8]] }
  0x45   :  { %1033 = vtanh.f32 %v87_v14  ;;  %v115_v27 = vadd.f32 %v112_v13, %v109_v20  ;;  %v116_v28 = vadd.f32 %v112_v13, %v110_v21  ;;  %v133_v29 = vmul.f32 %v132_v22, %v1442_v0  ;;  %s1555_s17 = sld [smem:[#allocation9 + $0x7]]  ;;  %s1562_s18 = sld [smem:[#allocation7 + $0x8]] }
  0x46   :  { %1035 = vtanh.f32 %v88_v15  ;;  %v134_v30 = vmul.f32 %v132_v22, %v1444_v1  ;;  %v135_v31 = vmul.f32 %v132_v22, %v1446_v2  ;;  %v136_v32 = vmul.f32 %v132_v22, %v1448_v3  ;;  %s1564_s19 = sld [smem:[#allocation3 + $0x9]]  ;;  %s1576_s21 = sld [smem:[#allocation9 + $0x8]] }
  0x47   :  { %1037 = vtanh.f32 %v89_v16  ;;  %v159_v33 = vmul.f32 %v158_v24, %v1442_v0  ;;  %v1485_v34 = vstv %s1454_s26  ;;  %v139_v35 = vadd.f32 %v138_v23, %v133_v29  ;;  %s1571_s20 = sld [smem:[#allocation7 + $0x9]]  ;;  %s1584_s22 = sld [smem:[#allocation3 + $0xa]] }
  0x48   :  { %1039 = vtanh.f32 %v90_v17  ;;  %v160_v36 = vmul.f32 %v158_v24, %v1444_v1  ;;  %v140_v37 = vadd.f32 %v138_v23, %v134_v30  ;;  %v141_v38 = vadd.f32 %v138_v23, %v135_v31  ;;  %s1586_s23 = sld [smem:[#allocation7 + $0xa]]  ;;  %s1592_s24 = sld [smem:[#allocation9 + $0x9]] }
  0x49   :  { %1041 = vtanh.f32 %v113_v25  ;;  %v1489_v39 = vstv %s1463_s27  ;;  %v161_v40 = vmul.f32 %v158_v24, %v1446_v2  ;;  %v162_v41 = vmul.f32 %v158_v24, %v1448_v3  ;;  %s1600_s25 = sld [smem:[#allocation3 + $0xb]]  ;;  %s1607_s26 = sld [smem:[#allocation9 + $0xa]] }
  0x4a   :  { %1043 = vtanh.f32 %v114_v26  ;;  %v164_v42 = vstv %s1465_s28  ;;  %v142_v43 = vadd.f32 %v138_v23, %v136_v32  ;;  %v1495_v45 = vstv %s1471_s3  ;;  %s1602_s4 = sld [smem:[#allocation7 + $0xb]]  ;;  %s1617_s1 = sld [smem:[#allocation3 + $0xc]] }
  0x4b   :  { %1045 = vtanh.f32 %v115_v27  ;;  %v165_v44 = vadd.f32 %v164_v42, %v159_v33  ;;  %v166_v46 = vadd.f32 %v164_v42, %v160_v36  ;;  %v184_v47 = vstv %s1473_s29  ;;  %s1619_s0 = sld [smem:[#allocation9 + $0xb]]  ;;  %s1626_s27 = sld [smem:[#allocation7 + $0xc]] }
  0x4c   :  { %1047 = vtanh.f32 %v116_v28  ;;  %v190_v48 = vstv %s1475_s30  ;;  %v185_v49 = vmul.f32 %v184_v47, %v1442_v0  ;;  %v186_v50 = vmul.f32 %v184_v47, %v1444_v1  ;;  %s1630_s28 = sld [smem:[#allocation3 + $0xd]]  ;;  %s1634_s29 = sld [smem:[#allocation9 + $0xc]] }
  0x4d   :  { %1049 = vtanh.f32 %v139_v35  ;;  %v187_v51 = vmul.f32 %v184_v47, %v1446_v2  ;;  %v167_v53 = vadd.f32 %v164_v42, %v161_v40  ;;  %v168_v54 = vadd.f32 %v164_v42, %v162_v41  ;;  %s1632_s3 = sld [smem:[#allocation7 + $0xd]]  ;;  %s1645_s30 = sld [smem:[#allocation3 + $0xe]] }
  0x4e   :  { %1051 = vtanh.f32 %v140_v37  ;;  %v188_v55 = vmul.f32 %v184_v47, %v1448_v3  ;;  %v191_v58 = vadd.f32 %v190_v48, %v185_v49  ;;  %v210_v59 = vstv %s1482_s6  ;;  %s1647_s6 = sld [smem:[#allocation7 + $0xe]] }
  0x4f   :  { %v1034_v52 = vpop.eup %1033  ;;  %1053 = vtanh.f32 %v141_v38  ;;  %v192_v62 = vadd.f32 %v190_v48, %v186_v50  ;;  %v193_v63 = vadd.f32 %v190_v48, %v187_v51  ;;  %v211_v13 = vmul.f32 %v210_v59, %v1442_v0 }
  0x50   :  { %v1036_v56 = vpop.eup %1035  ;;  %v96_v57 = vmul.f32 %v1034_v52, %v1461_v11  ;;  %1055 = vtanh.f32 %v142_v43  ;;  %v194_v7 = vadd.f32 %v190_v48, %v188_v55  ;;  %v212_v17 = vmul.f32 %v210_v59, %v1444_v1 }
  0x51   :  { %v1038_v60 = vpop.eup %1037  ;;  %v97_v61 = vmul.f32 %v1036_v56, %v1461_v11  ;;  %1057 = vtanh.f32 %v165_v44  ;;  %v214_v20 = vmul.f32 %v210_v59, %v1448_v3  ;;  %v216_v24 = vstv %s1502_s7  ;;  %s1649_s7 = sld [smem:[#allocation9 + $0xd]] }
  0x52   :  { %v1040_v4 = vpop.eup %1039  ;;  %v98_v5 = vmul.f32 %v1038_v60, %v1461_v11  ;;  %v100_v6 = vadd.f32 %v96_v57, %v1459_v10  ;;  %1059 = vtanh.f32 %v166_v46  ;;  %v217_v28 = vadd.f32 %v216_v24, %v211_v13 }
  0x53   :  { %v1042_v8 = vpop.eup %1041  ;;  %v99_v9 = vmul.f32 %v1040_v4, %v1461_v11  ;;  %v101_v12 = vadd.f32 %v97_v61, %v1459_v10  ;;  %1061 = vtanh.f32 %v167_v53  ;;  %v213_v11 = vmul.f32 %v210_v59, %v1446_v2 }
  0x54   :  { %v1044_v14 = vpop.eup %1043  ;;  %v102_v15 = vadd.f32 %v98_v5, %v1459_v10  ;;  %v122_v16 = vmul.f32 %v1042_v8, %v1485_v34  ;;  %1063 = vtanh.f32 %v168_v54  ;;  %v218_v32 = vadd.f32 %v216_v24, %v212_v17 }
  0x55   :  { %v1046_v18 = vpop.eup %1045  ;;  %v123_v19 = vmul.f32 %v1044_v14, %v1485_v34  ;;  %1065 = vtanh.f32 %v191_v58  ;;  %v103_v22 = vadd.f32 %v99_v9, %v1459_v10  ;;  %v199_v35 = vstv %s1508_s8  ;;  %s1660_s8 = sld [smem:[#allocation3 + $0xf]] }
  0x56   :  { %v1048_v21 = vpop.eup %1047  ;;  %v124_v23 = vmul.f32 %v1046_v18, %v1485_v34  ;;  %1067 = vtanh.f32 %v192_v62  ;;  %v126_v27 = vadd.f32 %v122_v16, %v100_v6  ;;  %v219_v36 = vadd.f32 %v216_v24, %v213_v11 }
  0x57   :  { %v1050_v25 = vpop.eup %1049  ;;  %v125_v26 = vmul.f32 %v1048_v21, %v1485_v34  ;;  %1069 = vtanh.f32 %v193_v63  ;;  %v127_v30 = vadd.f32 %v123_v19, %v101_v12  ;;  %v220_v37 = vadd.f32 %v216_v24, %v214_v20 }
  0x58   :  { %v1052_v29 = vpop.eup %1051  ;;  %v148_v31 = vmul.f32 %v1050_v25, %v1489_v39  ;;  %1071 = vtanh.f32 %v194_v7  ;;  %v128_v38 = vadd.f32 %v124_v23, %v102_v15  ;;  %v236_v46 = vstv %s1515_s9  ;;  %s1662_s9 = sld [smem:[#allocation7 + $0xf]] }
  0x59   :  { %v1054_v10 = vpop.eup %1053  ;;  %v149_v33 = vmul.f32 %v1052_v29, %v1489_v39  ;;  %v129_v40 = vadd.f32 %v125_v26, %v103_v22  ;;  %1073 = vtanh.f32 %v217_v28  ;;  %v237_v50 = vmul.f32 %v236_v46, %v1442_v0 }
  0x5a   :  { %v1056_v34 = vpop.eup %1055  ;;  %v150_v41 = vmul.f32 %v1054_v10, %v1489_v39  ;;  %v152_v44 = vadd.f32 %v148_v31, %v126_v27  ;;  %1075 = vtanh.f32 %v218_v32  ;;  %v225_v53 = vstv %s1521_s10  ;;  %s1668_s10 = sld [smem:[#allocation9 + $0xe]] }
  0x5b   :  { %v1058_v42 = vpop.eup %1057  ;;  %v151_v43 = vmul.f32 %v1056_v34, %v1489_v39  ;;  %v153_v48 = vadd.f32 %v149_v33, %v127_v30  ;;  %1077 = vtanh.f32 %v219_v36  ;;  %v238_v54 = vmul.f32 %v236_v46, %v1444_v1 }
  0x5c   :  { %v1060_v47 = vpop.eup %1059  ;;  %v174_v49 = vmul.f32 %v1058_v42, %v1495_v45  ;;  %1079 = vtanh.f32 %v220_v37  ;;  %v154_v39 = vadd.f32 %v150_v41, %v128_v38  ;;  %v239_v57 = vmul.f32 %v236_v46, %v1446_v2 }
  0x5d   :  { %v1062_v51 = vpop.eup %1061  ;;  %v175_v52 = vmul.f32 %v1060_v47, %v1495_v45  ;;  %v240_v58 = vmul.f32 %v236_v46, %v1448_v3  ;;  %v155_v60 = vadd.f32 %v151_v43, %v129_v40  ;;  %v242_v63 = vstv %s1529_s11  ;;  %s1679_s11 = sld [smem:[#allocation3 + $0x10]] }
  0x5e   :  { %v1064_v55 = vpop.eup %1063  ;;  %v176_v56 = vmul.f32 %v1062_v51, %v1495_v45  ;;  %v178_v62 = vadd.f32 %v174_v49, %v152_v44  ;;  %v243_v7 = vadd.f32 %v242_v63, %v237_v50  ;;  %v244_v8 = vadd.f32 %v242_v63, %v238_v54 }
  0x5f   :  { %v1066_v59 = vpop.eup %1065  ;;  %v177_v61 = vmul.f32 %v1064_v55, %v1495_v45  ;;  %v179_v5 = vadd.f32 %v175_v52, %v153_v48  ;;  %v245_v13 = vadd.f32 %v242_v63, %v239_v57  ;;  %v246_v14 = vadd.f32 %v242_v63, %v240_v58 }
  0x60   :  { %v1068_v4 = vpop.eup %1067  ;;  %v200_v6 = vmul.f32 %v1066_v59, %v199_v35  ;;  %v1558_v15 = vstv %s1534_s12  ;;  %v180_v17 = vadd.f32 %v176_v56, %v154_v39  ;;  %1081 = vtanh.f32 %v243_v7  ;;  %s1681_s12 = sld [smem:[#allocation7 + $0x10]] }
  0x61   :  { %v1070_v9 = vpop.eup %1069  ;;  %v201_v12 = vmul.f32 %v1068_v4, %v199_v35  ;;  %v262_v45 = vstv %s1537_s2  ;;  %v181_v19 = vadd.f32 %v177_v61, %v155_v60  ;;  %1083 = vtanh.f32 %v244_v8  ;;  %s1686_s2 = sld [smem:[#allocation9 + $0xf]] }
  0x62   :  { %v1072_v16 = vpop.eup %1071  ;;  %v202_v18 = vmul.f32 %v1070_v9, %v199_v35  ;;  %v263_v20 = vmul.f32 %v262_v45, %v1442_v0  ;;  %v204_v22 = vadd.f32 %v200_v6, %v178_v62  ;;  %1085 = vtanh.f32 %v245_v13 }
  0x63   :  { %v203_v11 = vmul.f32 %v1072_v16, %v199_v35  ;;  %v1074_v21 = vpop.eup %1073  ;;  %v264_v23 = vmul.f32 %v262_v45, %v1444_v1  ;;  %v265_v24 = vmul.f32 %v262_v45, %v1446_v2  ;;  %v205_v26 = vadd.f32 %v201_v12, %v179_v5 }
  0x64   :  { %v1076_v25 = vpop.eup %1075  ;;  %v226_v27 = vmul.f32 %v1074_v21, %v225_v53  ;;  %1087 = vtanh.f32 %v246_v14  ;;  %v266_v28 = vmul.f32 %v262_v45, %v1448_v3  ;;  %v206_v30 = vadd.f32 %v202_v18, %v180_v17 }
  0x65   :  { %v1078_v29 = vpop.eup %1077  ;;  %v227_v31 = vmul.f32 %v1076_v25, %v225_v53  ;;  %v268_v32 = vstv %s1549_s13  ;;  %v288_v10 = vstv %s1551_s14  ;;  %v207_v35 = vadd.f32 %v203_v11, %v181_v19  ;;  %s1694_s13 = sld [smem:[#allocation3 + $0x11]] }
  0x66   :  { %v1080_v33 = vpop.eup %1079  ;;  %v228_v36 = vmul.f32 %v1078_v29, %v225_v53  ;;  %v269_v37 = vadd.f32 %v268_v32, %v263_v20  ;;  %v270_v34 = vadd.f32 %v268_v32, %v264_v23  ;;  %v230_v38 = vadd.f32 %v226_v27, %v204_v22  ;;  %s1702_s14 = sld [smem:[#allocation7 + $0x11]] }
  0x67   :  { %v271_v40 = vadd.f32 %v268_v32, %v265_v24  ;;  %v272_v41 = vadd.f32 %v268_v32, %v266_v28  ;;  %v1574_v42 = vstv %s1555_s17  ;;  %v229_v43 = vmul.f32 %v1080_v33, %v225_v53  ;;  %s1705_s17 = sld [smem:[#allocation9 + $0x10]] }
  0x68   :  { %1089 = vtanh.f32 %v269_v37  ;;  %v289_v44 = vmul.f32 %v288_v10, %v1442_v0  ;;  %v290_v46 = vmul.f32 %v288_v10, %v1444_v1  ;;  %v231_v47 = vadd.f32 %v227_v31, %v205_v26 }
  0x69   :  { %1091 = vtanh.f32 %v270_v34  ;;  %v291_v48 = vmul.f32 %v288_v10, %v1446_v2  ;;  %v292_v49 = vmul.f32 %v288_v10, %v1448_v3  ;;  %v232_v50 = vadd.f32 %v228_v36, %v206_v30 }
  0x6a   :  { %1093 = vtanh.f32 %v271_v40  ;;  %v294_v51 = vstv %s1562_s18  ;;  %v314_v52 = vstv %s1564_s19  ;;  %v1082_v53 = vpop.eup %1081  ;;  %v233_v6 = vadd.f32 %v229_v43, %v207_v35  ;;  %s1713_s18 = sld [smem:[#allocation9 + $0x11]]  ;;  %s1716_s19 = sld [smem:[#allocation3 + $0x12]] }
  0x6b   :  { %1095 = vtanh.f32 %v272_v41  ;;  %v295_v54 = vadd.f32 %v294_v51, %v289_v44  ;;  %v296_v55 = vadd.f32 %v294_v51, %v290_v46  ;;  %v297_v39 = vadd.f32 %v294_v51, %v291_v48  ;;  %v1084_v56 = vpop.eup %1083 }
  0x6c   :  { %v252_v57 = vmul.f32 %v1082_v53, %v1558_v15  ;;  %v298_v58 = vadd.f32 %v294_v51, %v292_v49  ;;  %v315_v59 = vmul.f32 %v314_v52, %v1442_v0  ;;  %v316_v60 = vmul.f32 %v314_v52, %v1444_v1  ;;  %v1086_v61 = vpop.eup %1085 }
  0x6d   :  { %v253_v62 = vmul.f32 %v1084_v56, %v1558_v15  ;;  %1097 = vtanh.f32 %v295_v54  ;;  %v317_v63 = vmul.f32 %v314_v52, %v1446_v2  ;;  %v318_v4 = vmul.f32 %v314_v52, %v1448_v3 }
  0x6e   :  { %v1088_v5 = vpop.eup %1087  ;;  %v254_v7 = vmul.f32 %v1086_v61, %v1558_v15  ;;  %1099 = vtanh.f32 %v296_v55  ;;  %v320_v8 = vstv %s1571_s20  ;;  %v303_v12 = vstv %s1576_s21  ;;  %s1721_s20 = sld [smem:[#allocation7 + $0x12]]  ;;  %s1724_s21 = sld [smem:[#allocation3 + $0x13]] }
  0x6f   :  { %v255_v9 = vmul.f32 %v1088_v5, %v1558_v15  ;;  %1101 = vtanh.f32 %v297_v39  ;;  %v321_v13 = vadd.f32 %v320_v8, %v315_v59  ;;  %v256_v14 = vadd.f32 %v252_v57, %v230_v38 }
  0x70   :  { %1103 = vtanh.f32 %v298_v58  ;;  %v322_v16 = vadd.f32 %v320_v8, %v316_v60  ;;  %v323_v17 = vadd.f32 %v320_v8, %v317_v63  ;;  %v257_v18 = vadd.f32 %v253_v62, %v231_v47 }
  0x71   :  { %v258_v45 = vadd.f32 %v254_v7, %v232_v50  ;;  %v324_v19 = vadd.f32 %v320_v8, %v318_v4  ;;  %1105 = vtanh.f32 %v321_v13  ;;  %v259_v20 = vadd.f32 %v255_v9, %v233_v6 }
  0x72   :  { %v1090_v11 = vpop.eup %1089  ;;  %1107 = vtanh.f32 %v322_v16  ;;  %v340_v15 = vstv %s1584_s22  ;;  %v346_v21 = vstv %s1586_s23  ;;  %v329_v32 = vstv %s1592_s24  ;;  %s1726_s22 = sld [smem:[#allocation7 + $0x13]]  ;;  %s1730_s23 = sld [smem:[#allocation9 + $0x12]] }
  0x73   :  { %v1092_v22 = vpop.eup %1091  ;;  %v278_v23 = vmul.f32 %v1090_v11, %v1574_v42  ;;  %1109 = vtanh.f32 %v323_v17  ;;  %v341_v24 = vmul.f32 %v340_v15, %v1442_v0  ;;  %v342_v25 = vmul.f32 %v340_v15, %v1444_v1  ;;  %s1748_s24 = sld [smem:[#allocation3 + $0x14]] }
  0x74   :  { %v1094_v26 = vpop.eup %1093  ;;  %v279_v27 = vmul.f32 %v1092_v22, %v1574_v42  ;;  %1111 = vtanh.f32 %v324_v19  ;;  %v343_v28 = vmul.f32 %v340_v15, %v1446_v2  ;;  %v344_v29 = vmul.f32 %v340_v15, %v1448_v3 }
  0x75   :  { %v1096_v30 = vpop.eup %1095  ;;  %v280_v31 = vmul.f32 %v1094_v26, %v1574_v42  ;;  %v347_v10 = vadd.f32 %v346_v21, %v341_v24  ;;  %v348_v33 = vadd.f32 %v346_v21, %v342_v25  ;;  %v282_v36 = vadd.f32 %v278_v23, %v256_v14 }
  0x76   :  { %v281_v35 = vmul.f32 %v1096_v30, %v1574_v42  ;;  %v349_v37 = vadd.f32 %v346_v21, %v343_v28  ;;  %v350_v34 = vadd.f32 %v346_v21, %v344_v29  ;;  %v283_v40 = vadd.f32 %v279_v27, %v257_v18 }
  0x77   :  { %v1098_v38 = vpop.eup %1097  ;;  %v284_v41 = vadd.f32 %v280_v31, %v258_v45  ;;  %1113 = vtanh.f32 %v347_v10  ;;  %v366_v43 = vstv %s1600_s25  ;;  %v372_v48 = vstv %s1602_s4  ;;  %s1753_s25 = sld [smem:[#allocation9 + $0x13]]  ;;  %s1758_s4 = sld [smem:[#allocation7 + $0x14]] }
  0x78   :  { %v1100_v44 = vpop.eup %1099  ;;  %v304_v46 = vmul.f32 %v1098_v38, %v303_v12  ;;  %1115 = vtanh.f32 %v348_v33  ;;  %v367_v47 = vmul.f32 %v366_v43, %v1442_v0  ;;  %v368_v50 = vmul.f32 %v366_v43, %v1444_v1 }
  0x79   :  { %v1102_v42 = vpop.eup %1101  ;;  %v305_v49 = vmul.f32 %v1100_v44, %v303_v12  ;;  %1117 = vtanh.f32 %v349_v37  ;;  %v369_v51 = vmul.f32 %v366_v43, %v1446_v2  ;;  %v285_v53 = vadd.f32 %v281_v35, %v259_v20 }
  0x7a   :  { %v1104_v52 = vpop.eup %1103  ;;  %v306_v54 = vmul.f32 %v1102_v42, %v303_v12  ;;  %1119 = vtanh.f32 %v350_v34  ;;  %v370_v55 = vmul.f32 %v366_v43, %v1448_v3  ;;  %v355_v57 = vstv %s1607_s26  ;;  %s1760_s26 = sld [smem:[#allocation3 + $0x15]] }
  0x7b   :  { %v1106_v39 = vpop.eup %1105  ;;  %v307_v56 = vmul.f32 %v1104_v52, %v303_v12  ;;  %v373_v58 = vadd.f32 %v372_v48, %v367_v47  ;;  %v374_v59 = vadd.f32 %v372_v48, %v368_v50  ;;  %v308_v61 = vadd.f32 %v304_v46, %v282_v36 }
  0x7c   :  { %v1108_v60 = vpop.eup %1107  ;;  %v330_v62 = vmul.f32 %v1106_v39, %v329_v32  ;;  %v375_v63 = vadd.f32 %v372_v48, %v369_v51  ;;  %v376_v4 = vadd.f32 %v372_v48, %v370_v55  ;;  %v309_v6 = vadd.f32 %v305_v49, %v283_v40 }
  0x7d   :  { %v1110_v5 = vpop.eup %1109  ;;  %v310_v7 = vadd.f32 %v306_v54, %v284_v41  ;;  %v331_v8 = vmul.f32 %v1108_v60, %v329_v32  ;;  %1121 = vtanh.f32 %v373_v58  ;;  %v311_v12 = vadd.f32 %v307_v56, %v285_v53 }
  0x7e   :  { %v1112_v9 = vpop.eup %1111  ;;  %v332_v13 = vmul.f32 %v1110_v5, %v329_v32  ;;  %1123 = vtanh.f32 %v374_v59  ;;  %v392_v14 = vstv %s1617_s1  ;;  %v1638_v17 = vstv %s1619_s0  ;;  %s1766_s1 = sld [smem:[#allocation7 + $0x15]]  ;;  %s1776_s0 = sld [smem:[#allocation9 + $0x14]] }
  0x7f   :  { %v333_v16 = vmul.f32 %v1112_v9, %v329_v32  ;;  %1125 = vtanh.f32 %v375_v63  ;;  %v393_v18 = vmul.f32 %v392_v14, %v1442_v0  ;;  %v334_v45 = vadd.f32 %v330_v62, %v308_v61 }
  0x80   :  { %1127 = vtanh.f32 %v376_v4  ;;  %v394_v19 = vmul.f32 %v392_v14, %v1444_v1  ;;  %v395_v11 = vmul.f32 %v392_v14, %v1446_v2  ;;  %v335_v15 = vadd.f32 %v331_v8, %v309_v6 }
  0x81   :  { %v1114_v20 = vpop.eup %1113  ;;  %v336_v21 = vadd.f32 %v332_v13, %v310_v7  ;;  %v396_v22 = vmul.f32 %v392_v14, %v1448_v3  ;;  %v398_v23 = vstv %s1626_s27  ;;  %v337_v30 = vadd.f32 %v333_v16, %v311_v12  ;;  %s1782_s27 = sld [smem:[#allocation3 + $0x16]] }
  0x82   :  { %v1116_v24 = vpop.eup %1115  ;;  %v356_v25 = vmul.f32 %v1114_v20, %v355_v57  ;;  %v399_v26 = vadd.f32 %v398_v23, %v393_v18  ;;  %v400_v27 = vadd.f32 %v398_v23, %v394_v19  ;;  %v401_v28 = vadd.f32 %v398_v23, %v395_v11 }
  0x83   :  { %v1118_v29 = vpop.eup %1117  ;;  %v357_v31 = vmul.f32 %v1116_v24, %v355_v57  ;;  %v402_v32 = vadd.f32 %v398_v23, %v396_v22  ;;  %v418_v10 = vstv %s1630_s28  ;;  %v424_v37 = vstv %s1632_s3  ;;  %s1784_s28 = sld [smem:[#allocation9 + $0x15]]  ;;  %s1792_s3 = sld [smem:[#allocation7 + $0x16]] }
  0x84   :  { %v1120_v33 = vpop.eup %1119  ;;  %v358_v35 = vmul.f32 %v1118_v29, %v355_v57  ;;  %1129 = vtanh.f32 %v399_v26  ;;  %v419_v36 = vmul.f32 %v418_v10, %v1442_v0  ;;  %v1655_v38 = vstv %s1634_s29  ;;  %s1796_s29 = sld [smem:[#allocation3 + $0x17]] }
  0x85   :  { %v359_v34 = vmul.f32 %v1120_v33, %v355_v57  ;;  %1131 = vtanh.f32 %v400_v27  ;;  %v420_v40 = vmul.f32 %v418_v10, %v1444_v1  ;;  %v360_v41 = vadd.f32 %v356_v25, %v334_v45 }
  0x86   :  { %1133 = vtanh.f32 %v401_v28  ;;  %v421_v43 = vmul.f32 %v418_v10, %v1446_v2  ;;  %v422_v44 = vmul.f32 %v418_v10, %v1448_v3  ;;  %v361_v47 = vadd.f32 %v357_v31, %v335_v15 }
  0x87   :  { %v1122_v46 = vpop.eup %1121  ;;  %1135 = vtanh.f32 %v402_v32  ;;  %v425_v48 = vadd.f32 %v424_v37, %v419_v36  ;;  %v426_v42 = vadd.f32 %v424_v37, %v420_v40  ;;  %v362_v50 = vadd.f32 %v358_v35, %v336_v21 }
  0x88   :  { %v1124_v49 = vpop.eup %1123  ;;  %v382_v51 = vmul.f32 %v1122_v46, %v1638_v17  ;;  %v427_v52 = vadd.f32 %v424_v37, %v421_v43  ;;  %v428_v53 = vadd.f32 %v424_v37, %v422_v44  ;;  %v363_v55 = vadd.f32 %v359_v34, %v337_v30 }
  0x89   :  { %v1126_v54 = vpop.eup %1125  ;;  %v383_v39 = vmul.f32 %v1124_v49, %v1638_v17  ;;  %1137 = vtanh.f32 %v425_v48  ;;  %v444_v56 = vstv %s1645_s30  ;;  %v450_v60 = vstv %s1647_s6  ;;  %s1798_s30 = sld [smem:[#allocation7 + $0x17]]  ;;  %s1808_s6 = sld [smem:[#allocation9 + $0x16]] }
  0x8a   :  { %v1128_v57 = vpop.eup %1127  ;;  %v384_v58 = vmul.f32 %v1126_v54, %v1638_v17  ;;  %1139 = vtanh.f32 %v426_v42  ;;  %v445_v59 = vmul.f32 %v444_v56, %v1442_v0  ;;  %v386_v61 = vadd.f32 %v382_v51, %v360_v41 }
  0x8b   :  { %1141 = vtanh.f32 %v427_v52  ;;  %v1673_v62 = vstv %s1649_s7  ;;  %v446_v63 = vmul.f32 %v444_v56, %v1444_v1  ;;  %v385_v4 = vmul.f32 %v1128_v57, %v1638_v17  ;;  %s1813_s7 = sld [smem:[#allocation3 + $0x18]] }
  0x8c   :  { %1143 = vtanh.f32 %v428_v53  ;;  %v447_v5 = vmul.f32 %v444_v56, %v1446_v2  ;;  %v448_v6 = vmul.f32 %v444_v56, %v1448_v3  ;;  %v387_v7 = vadd.f32 %v383_v39, %v361_v47 }
  0x8d   :  { %v388_v8 = vadd.f32 %v384_v58, %v362_v50  ;;  %v451_v9 = vadd.f32 %v450_v60, %v445_v59  ;;  %v452_v12 = vadd.f32 %v450_v60, %v446_v63  ;;  %v470_v18 = vstv %s1660_s8  ;;  %s1815_s8 = sld [smem:[#allocation9 + $0x17]] }
  0x8e   :  { %v1130_v13 = vpop.eup %1129  ;;  %v453_v14 = vadd.f32 %v450_v60, %v447_v5  ;;  %v454_v16 = vadd.f32 %v450_v60, %v448_v6  ;;  %v476_v45 = vstv %s1662_s9  ;;  %v471_v11 = vmul.f32 %v470_v18, %v1442_v0  ;;  %s1823_s9 = sld [smem:[#allocation7 + $0x18]] }
  0x8f   :  { %v1132_v19 = vpop.eup %1131  ;;  %v408_v17 = vmul.f32 %v1130_v13, %v1655_v38  ;;  %1145 = vtanh.f32 %v451_v9  ;;  %v472_v20 = vmul.f32 %v470_v18, %v1444_v1  ;;  %v473_v22 = vmul.f32 %v470_v18, %v1446_v2 }
  0x90   :  { %v1134_v15 = vpop.eup %1133  ;;  %v409_v21 = vmul.f32 %v1132_v19, %v1655_v38  ;;  %1147 = vtanh.f32 %v452_v12  ;;  %v474_v23 = vmul.f32 %v470_v18, %v1448_v3  ;;  %v389_v25 = vadd.f32 %v385_v4, %v363_v55 }
  0x91   :  { %v1136_v24 = vpop.eup %1135  ;;  %v410_v26 = vmul.f32 %v1134_v15, %v1655_v38  ;;  %1149 = vtanh.f32 %v453_v14  ;;  %v477_v27 = vadd.f32 %v476_v45, %v471_v11  ;;  %v459_v29 = vstv %s1668_s10  ;;  %s1825_s10 = sld [smem:[#allocation3 + $0x19]] }
  0x92   :  { %v411_v28 = vmul.f32 %v1136_v24, %v1655_v38  ;;  %1151 = vtanh.f32 %v454_v16  ;;  %v478_v30 = vadd.f32 %v476_v45, %v472_v20  ;;  %v412_v32 = vadd.f32 %v408_v17, %v386_v61 }
  0x93   :  { %v1138_v31 = vpop.eup %1137  ;;  %v479_v10 = vadd.f32 %v476_v45, %v473_v22  ;;  %v480_v33 = vadd.f32 %v476_v45, %v474_v23  ;;  %1153 = vtanh.f32 %v477_v27  ;;  %v413_v36 = vadd.f32 %v409_v21, %v387_v7 }
  0x94   :  { %v1140_v35 = vpop.eup %1139  ;;  %v414_v37 = vadd.f32 %v410_v26, %v388_v8  ;;  %v434_v34 = vmul.f32 %v1138_v31, %v1673_v62  ;;  %1155 = vtanh.f32 %v478_v30  ;;  %v496_v41 = vstv %s1679_s11  ;;  %v1736_v30 = vld [vmem:[#allocation10] sm:$0xff]  ;;  %s1830_s11 = sld [smem:[#allocation7 + $0x19]] }
  0x95   :  { %v1142_v40 = vpop.eup %1141  ;;  %v435_v38 = vmul.f32 %v1140_v35, %v1673_v62  ;;  %1157 = vtanh.f32 %v479_v10  ;;  %v502_v43 = vstv %s1681_s12  ;;  %v415_v46 = vadd.f32 %v411_v28, %v389_v25  ;;  %v1742_v35 = vld [vmem:[#allocation10 + $0x10] sm:$0xff]  ;;  %s1837_s12 = sld [smem:[#allocation9 + $0x18]] }
  0x96   :  { %v1144_v44 = vpop.eup %1143  ;;  %v436_v47 = vmul.f32 %v1142_v40, %v1673_v62  ;;  %1159 = vtanh.f32 %v480_v33  ;;  %v497_v48 = vmul.f32 %v496_v41, %v1442_v0  ;;  %v438_v42 = vadd.f32 %v434_v34, %v412_v32  ;;  %v1739_v32 = vld [vmem:[#allocation10 + $0x8] sm:$0xff] }
  0x97   :  { %v485_v49 = vstv %s1686_s2  ;;  %v498_v50 = vmul.f32 %v496_v41, %v1444_v1  ;;  %v499_v51 = vmul.f32 %v496_v41, %v1446_v2  ;;  %v437_v52 = vmul.f32 %v1144_v44, %v1673_v62  ;;  %s1845_s2 = sld [smem:[#allocation3 + $0x1a]] }
  0x98   :  { %v439_v53 = vadd.f32 %v435_v38, %v413_v36  ;;  %v500_v54 = vmul.f32 %v496_v41, %v1448_v3  ;;  %v503_v55 = vadd.f32 %v502_v43, %v497_v48  ;;  %v440_v56 = vadd.f32 %v436_v47, %v414_v37  ;;  %v1745_v37 = vld [vmem:[#allocation10 + $0x18] sm:$0xff] }
  0x99   :  { %v1146_v39 = vpop.eup %1145  ;;  %v504_v57 = vadd.f32 %v502_v43, %v498_v50  ;;  %v505_v58 = vadd.f32 %v502_v43, %v499_v51  ;;  %v522_v59 = vstv %s1694_s13  ;;  %v441_v9 = vadd.f32 %v437_v52, %v415_v46  ;;  %s1848_s13 = sld [smem:[#allocation9 + $0x19]] }
  0x9a   :  { %v1148_v60 = vpop.eup %1147  ;;  %v460_v61 = vmul.f32 %v1146_v39, %v459_v29  ;;  %v506_v63 = vadd.f32 %v502_v43, %v500_v54  ;;  %1161 = vtanh.f32 %v503_v55  ;;  %v523_v4 = vmul.f32 %v522_v59, %v1442_v0 }
  0x9b   :  { %v1150_v62 = vpop.eup %1149  ;;  %v461_v5 = vmul.f32 %v1148_v60, %v459_v29  ;;  %1163 = vtanh.f32 %v504_v57  ;;  %v524_v6 = vmul.f32 %v522_v59, %v1444_v1  ;;  %v525_v7 = vmul.f32 %v522_v59, %v1446_v2 }
  0x9c   :  { %v1152_v8 = vpop.eup %1151  ;;  %v462_v12 = vmul.f32 %v1150_v62, %v459_v29  ;;  %1165 = vtanh.f32 %v505_v58  ;;  %v526_v13 = vmul.f32 %v522_v59, %v1448_v3  ;;  %v464_v16 = vadd.f32 %v460_v61, %v438_v42 }
  0x9d   :  { %v1154_v0 = vpop.eup %1153  ;;  %v463_v14 = vmul.f32 %v1152_v8, %v459_v29  ;;  %1167 = vtanh.f32 %v506_v63  ;;  %v528_v1 = vstv %s1702_s14  ;;  %v511_v45 = vstv %s1705_s17  ;;  %s1854_s14 = sld [smem:[#allocation7 + $0x1a]]  ;;  %s1857_s17 = sld [smem:[#allocation3 + $0x1b]] }
  0x9e   :  { %v1156_v18 = vpop.eup %1155  ;;  %v486_v2 = vmul.f32 %v1154_v0, %v485_v49  ;;  %v529_v19 = vadd.f32 %v528_v1, %v523_v4  ;;  %v530_v17 = vadd.f32 %v528_v1, %v524_v6  ;;  %v465_v20 = vadd.f32 %v461_v5, %v439_v53 }
  0x9f   :  { %v1158_v11 = vpop.eup %1157  ;;  %v487_v15 = vmul.f32 %v1156_v18, %v485_v49  ;;  %v531_v3 = vadd.f32 %v528_v1, %v525_v7  ;;  %v532_v21 = vadd.f32 %v528_v1, %v526_v13  ;;  %v466_v23 = vadd.f32 %v462_v12, %v440_v56 }
  0xa0   :  { %v1160_v22 = vpop.eup %1159  ;;  %v467_v24 = vadd.f32 %v463_v14, %v441_v9  ;;  %v488_v25 = vmul.f32 %v1158_v11, %v485_v49  ;;  %1169 = vtanh.f32 %v529_v19  ;;  %v490_v26 = vadd.f32 %v486_v2, %v464_v16 }
  0xa1   :  { %1171 = vtanh.f32 %v530_v17  ;;  %v1733_v27 = vstv %s1713_s18  ;;  %v548_v28 = vstv %s1716_s19  ;;  %v489_v29 = vmul.f32 %v1160_v22, %v485_v49  ;;  %s1859_s18 = sld [smem:[#allocation7 + $0x1b]]  ;;  %s1869_s19 = sld [smem:[#allocation9 + $0x1a]] }
  0xa2   :  { %1173 = vtanh.f32 %v531_v3  ;;  %v549_v31 = vmul.f32 %v1736_v30, %v548_v28  ;;  %v550_v10 = vmul.f32 %v1739_v32, %v548_v28  ;;  %v491_v33 = vadd.f32 %v487_v15, %v465_v20 }
  0xa3   :  { %1175 = vtanh.f32 %v532_v21  ;;  %v551_v36 = vmul.f32 %v1742_v35, %v548_v28  ;;  %v552_v34 = vmul.f32 %v1745_v37, %v548_v28  ;;  %v492_v38 = vadd.f32 %v488_v25, %v466_v23 }
  0xa4   :  { %v1162_v40 = vpop.eup %1161  ;;  %v554_v41 = vstv %s1721_s20  ;;  %v574_v43 = vstv %s1724_s21  ;;  %v580_v44 = vstv %s1726_s22  ;;  %v493_v39 = vadd.f32 %v489_v29, %v467_v24  ;;  %s1875_s20 = sld [smem:[#allocation3 + $0x1c]]  ;;  %s1885_s22 = sld [smem:[#allocation3 + $0x1d]] }
  0xa5   :  { %v1164_v46 = vpop.eup %1163  ;;  %v512_v47 = vmul.f32 %v1162_v40, %v511_v45  ;;  %v555_v48 = vadd.f32 %v554_v41, %v549_v31  ;;  %v556_v42 = vadd.f32 %v554_v41, %v550_v10  ;;  %v557_v49 = vadd.f32 %v554_v41, %v551_v36  ;;  %s1882_s21 = sld [smem:[#allocation7 + $0x1c]] }
  0xa6   :  { %v1166_v50 = vpop.eup %1165  ;;  %v513_v51 = vmul.f32 %v1164_v46, %v511_v45  ;;  %v558_v52 = vadd.f32 %v554_v41, %v552_v34  ;;  %v575_v53 = vmul.f32 %v1736_v30, %v574_v43  ;;  %v576_v54 = vmul.f32 %v1739_v32, %v574_v43 }
  0xa7   :  { %v1168_v55 = vpop.eup %1167  ;;  %v514_v56 = vmul.f32 %v1166_v50, %v511_v45  ;;  %1177 = vtanh.f32 %v555_v48  ;;  %v577_v57 = vmul.f32 %v1742_v35, %v574_v43  ;;  %v516_v58 = vadd.f32 %v512_v47, %v490_v26 }
  0xa8   :  { %1179 = vtanh.f32 %v556_v42  ;;  %v1763_v59 = vstv %s1730_s23  ;;  %v578_v60 = vmul.f32 %v1745_v37, %v574_v43  ;;  %v515_v61 = vmul.f32 %v1168_v55, %v511_v45  ;;  %s1888_s23 = sld [smem:[#allocation7 + $0x1d]] }
  0xa9   :  { %1181 = vtanh.f32 %v557_v49  ;;  %v581_v63 = vadd.f32 %v580_v44, %v575_v53  ;;  %v582_v4 = vadd.f32 %v580_v44, %v576_v54  ;;  %v517_v5 = vadd.f32 %v513_v51, %v491_v33 }
  0xaa   :  { %v1170_v62 = vpop.eup %1169  ;;  %1183 = vtanh.f32 %v558_v52  ;;  %v583_v6 = vadd.f32 %v580_v44, %v577_v57  ;;  %v584_v7 = vadd.f32 %v580_v44, %v578_v60  ;;  %v518_v9 = vadd.f32 %v514_v56, %v492_v38 }
  0xab   :  { %v1172_v8 = vpop.eup %1171  ;;  %v538_v12 = vmul.f32 %v1170_v62, %v1733_v27  ;;  %1185 = vtanh.f32 %v581_v63  ;;  %v600_v13 = vstv %s1748_s24  ;;  %v519_v2 = vadd.f32 %v515_v61, %v493_v39  ;;  %s1892_s24 = sld [smem:[#allocation9 + $0x1b]] }
  0xac   :  { %v1174_v0 = vpop.eup %1173  ;;  %v539_v14 = vmul.f32 %v1172_v8, %v1733_v27  ;;  %1187 = vtanh.f32 %v582_v4  ;;  %v601_v16 = vmul.f32 %v1736_v30, %v600_v13  ;;  %v602_v1 = vmul.f32 %v1739_v32, %v600_v13 }
  0xad   :  { %v1176_v18 = vpop.eup %1175  ;;  %v540_v45 = vmul.f32 %v1174_v0, %v1733_v27  ;;  %1189 = vtanh.f32 %v583_v6  ;;  %v603_v19 = vmul.f32 %v1742_v35, %v600_v13  ;;  %v542_v17 = vadd.f32 %v538_v12, %v516_v58 }
  0xae   :  { %1191 = vtanh.f32 %v584_v7  ;;  %v589_v11 = vstv %s1753_s25  ;;  %v604_v20 = vmul.f32 %v1745_v37, %v600_v13  ;;  %v541_v15 = vmul.f32 %v1176_v18, %v1733_v27  ;;  %s1896_s25 = sld [smem:[#allocation9 + $0x1c]] }
  0xaf   :  { %v543_v3 = vadd.f32 %v539_v14, %v517_v5  ;;  %v606_v21 = vstv %s1758_s4  ;;  %v626_v22 = vstv %s1760_s26  ;;  %v544_v23 = vadd.f32 %v540_v45, %v518_v9  ;;  %s1900_s4 = sld [smem:[#allocation3 + $0x1e]] }
  0xb0   :  { %v607_v24 = vadd.f32 %v606_v21, %v601_v16  ;;  %v608_v25 = vadd.f32 %v606_v21, %v602_v1  ;;  %v609_v26 = vadd.f32 %v606_v21, %v603_v19  ;;  %v610_v29 = vadd.f32 %v606_v21, %v604_v20  ;;  %s1907_s26 = sld [smem:[#allocation7 + $0x1e]] }
  0xb1   :  { %v1178_v28 = vpop.eup %1177  ;;  %v627_v31 = vmul.f32 %v1736_v30, %v626_v22  ;;  %v628_v10 = vmul.f32 %v1739_v32, %v626_v22  ;;  %v629_v27 = vmul.f32 %v1742_v35, %v626_v22  ;;  %v630_v34 = vmul.f32 %v1745_v37, %v626_v22 }
  0xb2   :  { %v1180_v33 = vpop.eup %1179  ;;  %v564_v36 = vmul.f32 %v1178_v28, %v1763_v59  ;;  %1193 = vtanh.f32 %v607_v24  ;;  %v632_v40 = vstv %s1766_s1  ;;  %v545_v47 = vadd.f32 %v541_v15, %v519_v2  ;;  %s1909_s1 = sld [smem:[#allocation9 + $0x1d]] }
  0xb3   :  { %v1182_v38 = vpop.eup %1181  ;;  %v565_v41 = vmul.f32 %v1180_v33, %v1763_v59  ;;  %1195 = vtanh.f32 %v608_v25  ;;  %v633_v43 = vadd.f32 %v632_v40, %v627_v31  ;;  %v634_v44 = vadd.f32 %v632_v40, %v628_v10 }
  0xb4   :  { %v1184_v46 = vpop.eup %1183  ;;  %v566_v48 = vmul.f32 %v1182_v38, %v1763_v59  ;;  %1197 = vtanh.f32 %v609_v26  ;;  %v635_v42 = vadd.f32 %v632_v40, %v629_v27  ;;  %v568_v51 = vadd.f32 %v564_v36, %v542_v17 }
  0xb5   :  { %v1186_v49 = vpop.eup %1185  ;;  %v567_v50 = vmul.f32 %v1184_v46, %v1763_v59  ;;  %1199 = vtanh.f32 %v610_v29  ;;  %v636_v52 = vadd.f32 %v632_v40, %v630_v34  ;;  %v569_v54 = vadd.f32 %v565_v41, %v543_v3 }
  0xb6   :  { %v1188_v53 = vpop.eup %1187  ;;  %v590_v55 = vmul.f32 %v1186_v49, %v589_v11  ;;  %v615_v39 = vstv %s1776_s0  ;;  %1201 = vtanh.f32 %v633_v43  ;;  %v570_v57 = vadd.f32 %v566_v48, %v544_v23  ;;  %s1912_s0 = sld [smem:[#allocation3 + $0x1f]] }
  0xb7   :  { %v1190_v56 = vpop.eup %1189  ;;  %v591_v58 = vmul.f32 %v1188_v53, %v589_v11  ;;  %1203 = vtanh.f32 %v634_v44  ;;  %v652_v60 = vstv %s1782_s27  ;;  %v1804_v4 = vstv %s1784_s28  ;;  %s1914_s27 = sld [smem:[#allocation7 + $0x1f]]  ;;  %s1927_s28 = sld [smem:[#allocation9 + $0x1e]] }
  0xb8   :  { %v1192_v61 = vpop.eup %1191  ;;  %v592_v63 = vmul.f32 %v1190_v56, %v589_v11  ;;  %1205 = vtanh.f32 %v635_v42  ;;  %v653_v59 = vmul.f32 %v1736_v30, %v652_v60  ;;  %v571_v62 = vadd.f32 %v567_v50, %v545_v47 }
  0xb9   :  { %v594_v5 = vadd.f32 %v590_v55, %v568_v51  ;;  %1207 = vtanh.f32 %v636_v52  ;;  %v654_v6 = vmul.f32 %v1739_v32, %v652_v60  ;;  %v593_v7 = vmul.f32 %v1192_v61, %v589_v11 }
  0xba   :  { %v655_v8 = vmul.f32 %v1742_v35, %v652_v60  ;;  %v656_v9 = vmul.f32 %v1745_v37, %v652_v60  ;;  %v658_v12 = vstv %s1792_s3  ;;  %v595_v13 = vadd.f32 %v591_v58, %v569_v54  ;;  %s1023_s3 = sld [smem:[#allocation9 + $0x1f]] }
  0xbb   :  { %v596_v0 = vadd.f32 %v592_v63, %v570_v57  ;;  %v659_v14 = vadd.f32 %v658_v12, %v653_v59  ;;  %v660_v16 = vadd.f32 %v658_v12, %v654_v6  ;;  %v678_v45 = vstv %s1796_s29  ;;  %s1387_s29 = smov [#allocation11]  }
  0xbc   :  { %v1194_v1 = vpop.eup %1193  ;;  %v661_v18 = vadd.f32 %v658_v12, %v655_v8  ;;  %v662_v2 = vadd.f32 %v658_v12, %v656_v9  ;;  %v684_v19 = vstv %s1798_s30  ;;  %v679_v20 = vmul.f32 %v1736_v30, %v678_v45  ;;  %s919_s30 = sshll.u32 %s1387_s29, 4  ;;  %s920_s30 = int_to_ptr.vmem [resolvable:$true] %s919_s30 }
  0xbd   :  { %v1196_v17 = vpop.eup %1195  ;;  %v616_v11 = vmul.f32 %v1194_v1, %v615_v39  ;;  %1209 = vtanh.f32 %v659_v14  ;;  %v680_v15 = vmul.f32 %v1739_v32, %v678_v45  ;;  %v681_v22 = vmul.f32 %v1742_v35, %v678_v45  ;;  %p1356_p10 = scmp.lt.s32.totalorder %s920_s30, %s920_s30 }
  0xbe   :  { %v1198_v3 = vpop.eup %1197  ;;  %v617_v21 = vmul.f32 %v1196_v17, %v615_v39  ;;  %1211 = vtanh.f32 %v660_v16  ;;  %v682_v23 = vmul.f32 %v1745_v37, %v678_v45  ;;  %v597_v25 = vadd.f32 %v593_v7, %v571_v62 }
  0xbf   :  { %v1200_v24 = vpop.eup %1199  ;;  %v618_v26 = vmul.f32 %v1198_v3, %v615_v39  ;;  %1213 = vtanh.f32 %v661_v18  ;;  %v685_v28 = vadd.f32 %v684_v19, %v679_v20  ;;  %v686_v10 = vadd.f32 %v684_v19, %v680_v15 }
  0xc0   :  { %v1202_v29 = vpop.eup %1201  ;;  %v619_v31 = vmul.f32 %v1200_v24, %v615_v39  ;;  %1215 = vtanh.f32 %v662_v2  ;;  %v620_v33 = vadd.f32 %v616_v11, %v594_v5  ;;  %v687_v34 = vadd.f32 %v684_v19, %v681_v22 }
  0xc1   :  { %v1204_v27 = vpop.eup %1203  ;;  %v642_v36 = vmul.f32 %v1202_v29, %v1804_v4  ;;  %v688_v40 = vadd.f32 %v684_v19, %v682_v23  ;;  %v621_v41 = vadd.f32 %v617_v21, %v595_v13  ;;  %v667_v44 = vstv %s1808_s6  ;;  %s1351_s6 = scalar_lea.vmem %s920_s30, 512 }
  0xc2   :  { %v1206_v38 = vpop.eup %1205  ;;  %v643_v43 = vmul.f32 %v1204_v27, %v1804_v4  ;;  %1217 = vtanh.f32 %v685_v28  ;;  %v622_v47 = vadd.f32 %v618_v26, %v596_v0  ;;  %v623_v48 = vadd.f32 %v619_v31, %v597_v25  ;;  %p1352_p9 = scmp.ne.s32.totalorder %s920_s30, %s1351_s6  ;;  %p1357_p11 = scmp.lt.s32.totalorder %s1351_s6, %s1351_s6 }
  0xc3   :  { %v1208_v46 = vpop.eup %1207  ;;  %1219 = vtanh.f32 %v686_v10  ;;  %v704_v42 = vstv %s1813_s7  ;;  %v644_v49 = vmul.f32 %v1206_v38, %v1804_v4  ;;  %v1835_v50 = vstv %s1815_s8 }
  0xc4   :  { %1221 = vtanh.f32 %v687_v34  ;;  %v705_v51 = vmul.f32 %v1736_v30, %v704_v42  ;;  %v646_v52 = vadd.f32 %v642_v36, %v620_v33  ;;  %v706_v53 = vmul.f32 %v1739_v32, %v704_v42  ;;  %p1358_p12 = por %p1357_p11, %p1356_p10 }
  0xc5   :  { %1223 = vtanh.f32 %v688_v40  ;;  %v707_v54 = vmul.f32 %v1742_v35, %v704_v42  ;;  %v645_v55 = vmul.f32 %v1208_v46, %v1804_v4  ;;  %v647_v39 = vadd.f32 %v643_v43, %v621_v41 }
  0xc6   :  { %v708_v56 = vmul.f32 %v1745_v37, %v704_v42  ;;  %v710_v57 = vstv %s1823_s9  ;;  %v730_v59 = vstv %s1825_s10  ;;  %v648_v5 = vadd.f32 %v644_v49, %v622_v47  ;;  %p1359_p13 = pnand %p1358_p12, %p1352_p9 }
  0xc7   :  { %v1210_v58 = vpop.eup %1209  ;;  %v711_v60 = vadd.f32 %v710_v57, %v705_v51  ;;  %v712_v61 = vadd.f32 %v710_v57, %v706_v53  ;;  %v713_v63 = vadd.f32 %v710_v57, %v707_v54  ;;  %v731_v7 = vmul.f32 %v1736_v30, %v730_v59 }
  0xc8   :  { %v1212_v62 = vpop.eup %1211  ;;  %v714_v6 = vadd.f32 %v710_v57, %v708_v56  ;;  %v732_v4 = vmul.f32 %v1739_v32, %v730_v59  ;;  %v668_v9 = vmul.f32 %v1210_v58, %v667_v44  ;;  %v733_v12 = vmul.f32 %v1742_v35, %v730_v59 }
  0xc9   :  { %v1214_v8 = vpop.eup %1213  ;;  %1225 = vtanh.f32 %v711_v60  ;;  %v734_v13 = vmul.f32 %v1745_v37, %v730_v59  ;;  %v649_v14 = vadd.f32 %v645_v55, %v623_v48  ;;  %v669_v16 = vmul.f32 %v1212_v62, %v667_v44 }
  0xca   :  { %v1216_v0 = vpop.eup %1215  ;;  %1227 = vtanh.f32 %v712_v61  ;;  %v736_v1 = vstv %s1830_s11  ;;  %v670_v18 = vmul.f32 %v1214_v8, %v667_v44  ;;  %v719_v17 = vstv %s1837_s12 }
  0xcb   :  { %v671_v2 = vmul.f32 %v1216_v0, %v667_v44  ;;  %1229 = vtanh.f32 %v713_v63  ;;  %v737_v45 = vadd.f32 %v736_v1, %v731_v7  ;;  %v738_v11 = vadd.f32 %v736_v1, %v732_v4 }
  0xcc   :  { %v1218_v19 = vpop.eup %1217  ;;  %1231 = vtanh.f32 %v714_v6  ;;  %v739_v20 = vadd.f32 %v736_v1, %v733_v12  ;;  %v672_v3 = vadd.f32 %v668_v9, %v646_v52  ;;  %v740_v22 = vadd.f32 %v736_v1, %v734_v13 }
  0xcd   :  { %v1220_v15 = vpop.eup %1219  ;;  %v694_v21 = vmul.f32 %v1218_v19, %v1835_v50  ;;  %1233 = vtanh.f32 %v737_v45  ;;  %v673_v24 = vadd.f32 %v669_v16, %v647_v39  ;;  %v756_v26 = vstv %s1845_s2 }
  0xce   :  { %v1222_v23 = vpop.eup %1221  ;;  %v695_v25 = vmul.f32 %v1220_v15, %v1835_v50  ;;  %1235 = vtanh.f32 %v738_v11  ;;  %v674_v29 = vadd.f32 %v670_v18, %v648_v5  ;;  %v675_v31 = vadd.f32 %v671_v2, %v649_v14 }
  0xcf   :  { %v1224_v28 = vpop.eup %1223  ;;  %1237 = vtanh.f32 %v739_v20  ;;  %v757_v10 = vmul.f32 %v1736_v30, %v756_v26  ;;  %v696_v27 = vmul.f32 %v1222_v23, %v1835_v50  ;;  %v745_v33 = vstv %s1848_s13 }
  0xd0   :  { %1239 = vtanh.f32 %v740_v22  ;;  %v758_v36 = vmul.f32 %v1739_v32, %v756_v26  ;;  %v698_v34 = vadd.f32 %v694_v21, %v672_v3  ;;  %v759_v40 = vmul.f32 %v1742_v35, %v756_v26 }
  0xd1   :  { %v760_v38 = vmul.f32 %v1745_v37, %v756_v26  ;;  %v762_v41 = vstv %s1854_s14  ;;  %v697_v43 = vmul.f32 %v1224_v28, %v1835_v50  ;;  %v699_v44 = vadd.f32 %v695_v25, %v673_v24 }
  0xd2   :  { %v763_v46 = vadd.f32 %v762_v41, %v757_v10  ;;  %v764_v47 = vadd.f32 %v762_v41, %v758_v36  ;;  %v765_v42 = vadd.f32 %v762_v41, %v759_v40  ;;  %v782_v51 = vstv %s1857_s17 }
  0xd3   :  { %v1226_v48 = vpop.eup %1225  ;;  %v766_v49 = vadd.f32 %v762_v41, %v760_v38  ;;  %v788_v52 = vstv %s1859_s18  ;;  %v783_v55 = vmul.f32 %v1736_v30, %v782_v51  ;;  %v784_v39 = vmul.f32 %v1739_v32, %v782_v51 }
  0xd4   :  { %v1228_v53 = vpop.eup %1227  ;;  %v720_v54 = vmul.f32 %v1226_v48, %v719_v17  ;;  %1241 = vtanh.f32 %v763_v46  ;;  %v700_v57 = vadd.f32 %v696_v27, %v674_v29  ;;  %v785_v58 = vmul.f32 %v1742_v35, %v782_v51 }
  0xd5   :  { %v1230_v56 = vpop.eup %1229  ;;  %v721_v50 = vmul.f32 %v1228_v53, %v719_v17  ;;  %1243 = vtanh.f32 %v764_v47  ;;  %v701_v61 = vadd.f32 %v697_v43, %v675_v31  ;;  %v786_v59 = vmul.f32 %v1745_v37, %v782_v51 }
  0xd6   :  { %v1232_v60 = vpop.eup %1231  ;;  %v722_v63 = vmul.f32 %v1230_v56, %v719_v17  ;;  %1245 = vtanh.f32 %v765_v42  ;;  %v724_v6 = vadd.f32 %v720_v54, %v698_v34  ;;  %v789_v7 = vadd.f32 %v788_v52, %v783_v55 }
  0xd7   :  { %v1234_v62 = vpop.eup %1233  ;;  %v723_v5 = vmul.f32 %v1232_v60, %v719_v17  ;;  %1247 = vtanh.f32 %v766_v49  ;;  %v790_v9 = vadd.f32 %v788_v52, %v784_v39  ;;  %v725_v13 = vadd.f32 %v721_v50, %v699_v44 }
  0xd8   :  { %v1236_v4 = vpop.eup %1235  ;;  %v746_v8 = vmul.f32 %v1234_v62, %v745_v33  ;;  %v771_v14 = vstv %s1869_s19  ;;  %v791_v16 = vadd.f32 %v788_v52, %v785_v58  ;;  %v726_v18 = vadd.f32 %v722_v63, %v700_v57 }
  0xd9   :  { %v1238_v12 = vpop.eup %1237  ;;  %v747_v0 = vmul.f32 %v1236_v4, %v745_v33  ;;  %v727_v2 = vadd.f32 %v723_v5, %v701_v61  ;;  %v792_v45 = vadd.f32 %v788_v52, %v786_v59  ;;  %v808_v19 = vstv %s1875_s20 }
  0xda   :  { %v1240_v1 = vpop.eup %1239  ;;  %v748_v17 = vmul.f32 %v1238_v12, %v745_v33  ;;  %v750_v11 = vadd.f32 %v746_v8, %v724_v6  ;;  %1249 = vtanh.f32 %v789_v7  ;;  %v809_v20 = vmul.f32 %v1736_v30, %v808_v19 }
  0xdb   :  { %v749_v15 = vmul.f32 %v1240_v1, %v745_v33  ;;  %1251 = vtanh.f32 %v790_v9  ;;  %v810_v3 = vmul.f32 %v1739_v32, %v808_v19  ;;  %v811_v21 = vmul.f32 %v1742_v35, %v808_v19 }
  0xdc   :  { %v751_v22 = vadd.f32 %v747_v0, %v725_v13  ;;  %1253 = vtanh.f32 %v791_v16  ;;  %v812_v23 = vmul.f32 %v1745_v37, %v808_v19  ;;  %v814_v24 = vstv %s1882_s21 }
  0xdd   :  { %v815_v26 = vadd.f32 %v814_v24, %v809_v20  ;;  %v816_v28 = vadd.f32 %v814_v24, %v810_v3  ;;  %v817_v29 = vadd.f32 %v814_v24, %v811_v21  ;;  %v834_v31 = vstv %s1885_s22 }
  0xde   :  { %v1242_v25 = vpop.eup %1241  ;;  %1255 = vtanh.f32 %v792_v45  ;;  %v818_v27 = vadd.f32 %v814_v24, %v812_v23  ;;  %v835_v33 = vmul.f32 %v1736_v30, %v834_v31  ;;  %v836_v36 = vmul.f32 %v1739_v32, %v834_v31 }
  0xdf   :  { %v1244_v10 = vpop.eup %1243  ;;  %v752_v40 = vadd.f32 %v748_v17, %v726_v18  ;;  %1257 = vtanh.f32 %v815_v26  ;;  %v837_v38 = vmul.f32 %v1742_v35, %v834_v31  ;;  %v838_v41 = vmul.f32 %v1745_v37, %v834_v31 }
  0xe0   :  { %v1246_v34 = vpop.eup %1245  ;;  %v753_v44 = vadd.f32 %v749_v15, %v727_v2  ;;  %v772_v46 = vmul.f32 %v1242_v25, %v771_v14  ;;  %1259 = vtanh.f32 %v816_v28  ;;  %v840_v47 = vstv %s1888_s23 }
  0xe1   :  { %v1248_v43 = vpop.eup %1247  ;;  %v773_v48 = vmul.f32 %v1244_v10, %v771_v14  ;;  %v774_v42 = vmul.f32 %v1246_v34, %v771_v14  ;;  %1261 = vtanh.f32 %v817_v29  ;;  %v841_v49 = vadd.f32 %v840_v47, %v835_v33 }
  0xe2   :  { %v775_v51 = vmul.f32 %v1248_v43, %v771_v14  ;;  %1263 = vtanh.f32 %v818_v27  ;;  %v842_v52 = vadd.f32 %v840_v47, %v836_v36  ;;  %v843_v53 = vadd.f32 %v840_v47, %v837_v38 }
  0xe3   :  { %v844_v54 = vadd.f32 %v840_v47, %v838_v41  ;;  %1265 = vtanh.f32 %v841_v49  ;;  %v797_v39 = vstv %s1892_s24  ;;  %v823_v56 = vstv %s1896_s25 }
  0xe4   :  { %v1250_v55 = vpop.eup %1249  ;;  %1267 = vtanh.f32 %v842_v52  ;;  %v860_v57 = vstv %s1900_s4  ;;  %v776_v58 = vadd.f32 %v772_v46, %v750_v11  ;;  %v777_v60 = vadd.f32 %v773_v48, %v751_v22 }
  0xe5   :  { %v1252_v50 = vpop.eup %1251  ;;  %1269 = vtanh.f32 %v843_v53  ;;  %v861_v61 = vmul.f32 %v1736_v30, %v860_v57  ;;  %v778_v59 = vadd.f32 %v774_v42, %v752_v40  ;;  %v779_v62 = vadd.f32 %v775_v51, %v753_v44 }
  0xe6   :  { %v1254_v63 = vpop.eup %1253  ;;  %1271 = vtanh.f32 %v844_v54  ;;  %v862_v5 = vmul.f32 %v1739_v32, %v860_v57  ;;  %v798_v6 = vmul.f32 %v1250_v55, %v797_v39  ;;  %v863_v7 = vmul.f32 %v1742_v35, %v860_v57 }
  0xe7   :  { %v864_v4 = vmul.f32 %v1745_v37, %v860_v57  ;;  %v866_v8 = vstv %s1907_s26  ;;  %v799_v12 = vmul.f32 %v1252_v50, %v797_v39  ;;  %v849_v13 = vstv %s1909_s1 }
  0xe8   :  { %v1256_v9 = vpop.eup %1255  ;;  %v867_v0 = vadd.f32 %v866_v8, %v861_v61  ;;  %v868_v14 = vadd.f32 %v866_v8, %v862_v5  ;;  %v869_v1 = vadd.f32 %v866_v8, %v863_v7  ;;  %v886_v2 = vstv %s1912_s0 }
  0xe9   :  { %v1258_v16 = vpop.eup %1257  ;;  %v870_v18 = vadd.f32 %v866_v8, %v864_v4  ;;  %v892_v45 = vstv %s1914_s27  ;;  %v800_v17 = vmul.f32 %v1254_v63, %v797_v39  ;;  %v887_v11 = vmul.f32 %v1736_v30, %v886_v2 }
  0xea   :  { %v1260_v19 = vpop.eup %1259  ;;  %1273 = vtanh.f32 %v867_v0  ;;  %v888_v20 = vmul.f32 %v1739_v32, %v886_v2  ;;  %v801_v3 = vmul.f32 %v1256_v9, %v797_v39  ;;  %v889_v21 = vmul.f32 %v1742_v35, %v886_v2 }
  0xeb   :  { %v1262_v15 = vpop.eup %1261  ;;  %1275 = vtanh.f32 %v868_v14  ;;  %v890_v22 = vmul.f32 %v1745_v37, %v886_v2  ;;  %v802_v24 = vadd.f32 %v798_v6, %v776_v58  ;;  %v824_v25 = vmul.f32 %v1258_v16, %v823_v56 }
  0xec   :  { %v1264_v23 = vpop.eup %1263  ;;  %1277 = vtanh.f32 %v869_v1  ;;  %v893_v26 = vadd.f32 %v892_v45, %v887_v11  ;;  %v803_v29 = vadd.f32 %v799_v12, %v777_v60  ;;  %v825_v31 = vmul.f32 %v1260_v19, %v823_v56 }
  0xed   :  { %v1266_v28 = vpop.eup %1265  ;;  %1279 = vtanh.f32 %v870_v18  ;;  %v894_v10 = vadd.f32 %v892_v45, %v888_v20  ;;  %v804_v27 = vadd.f32 %v800_v17, %v778_v59  ;;  %v826_v32 = vmul.f32 %v1262_v15, %v823_v56 }
  0xee   :  { %v1268_v30 = vpop.eup %1267  ;;  %v895_v33 = vadd.f32 %v892_v45, %v889_v21  ;;  %v896_v36 = vadd.f32 %v892_v45, %v890_v22  ;;  %v805_v35 = vadd.f32 %v801_v3, %v779_v62  ;;  %v827_v40 = vmul.f32 %v1264_v23, %v823_v56 }
  0xef   :  { %v1270_v34 = vpop.eup %1269  ;;  %1281 = vtanh.f32 %v893_v26  ;;  %v828_v38 = vadd.f32 %v824_v25, %v802_v24  ;;  %v850_v41 = vmul.f32 %v1266_v28, %v849_v13  ;;  %v829_v43 = vadd.f32 %v825_v31, %v803_v29 }
  0xf0   :  { %v1272_v37 = vpop.eup %1271  ;;  %1283 = vtanh.f32 %v894_v10  ;;  %v851_v44 = vmul.f32 %v1268_v30, %v849_v13  ;;  %v830_v46 = vadd.f32 %v826_v32, %v804_v27  ;;  %v852_v47 = vmul.f32 %v1270_v34, %v849_v13 }
  0xf1   :  { %1285 = vtanh.f32 %v895_v33  ;;  %v875_v48 = vstv %s1927_s28  ;;  %v831_v42 = vadd.f32 %v827_v40, %v805_v35  ;;  %v853_v49 = vmul.f32 %v1272_v37, %v849_v13 }
  0xf2   :  { %1287 = vtanh.f32 %v896_v36  ;;  %v854_v52 = vadd.f32 %v850_v41, %v828_v38  ;;  %v855_v54 = vadd.f32 %v851_v44, %v829_v43  ;;  %v856_v56 = vadd.f32 %v852_v47, %v830_v46 }
  0xf3   :  { %v857_v58 = vadd.f32 %v853_v49, %v831_v42  ;;  %v901_v61 = vstv %s1023_s3 }
  0xf4   :  { %v1274_v51 = vpop.eup %1273 }
  0xf5   :  { %v1276_v53 = vpop.eup %1275  ;;  %v876_v55 = vmul.f32 %v1274_v51, %v875_v48 }
  0xf6   :  { %v1278_v39 = vpop.eup %1277  ;;  %v877_v57 = vmul.f32 %v1276_v53, %v875_v48 }
  0xf7   :  { %v1280_v50 = vpop.eup %1279  ;;  %v878_v60 = vmul.f32 %v1278_v39, %v875_v48  ;;  %v880_v59 = vadd.f32 %v876_v55, %v854_v52 }
  0xf8   :  { %v879_v63 = vmul.f32 %v1280_v50, %v875_v48  ;;  %v881_v5 = vadd.f32 %v877_v57, %v855_v54 }
  0xf9   :  { %v1282_v62 = vpop.eup %1281  ;;  %v882_v7 = vadd.f32 %v878_v60, %v856_v56 }
  0xfa   :  { %v1284_v6 = vpop.eup %1283  ;;  %v902_v4 = vmul.f32 %v1282_v62, %v901_v61  ;;  %v883_v9 = vadd.f32 %v879_v63, %v857_v58 }
  0xfb   :  { %v1286_v8 = vpop.eup %1285  ;;  %v903_v12 = vmul.f32 %v1284_v6, %v901_v61 }
  0xfc   :  { %v1288_v13 = vpop.eup %1287  ;;  %v904_v0 = vmul.f32 %v1286_v8, %v901_v61  ;;  %v906_v14 = vadd.f32 %v902_v4, %v880_v59 }
  0xfd   :  { %v905_v16 = vmul.f32 %v1288_v13, %v901_v61  ;;  %v907_v1 = vadd.f32 %v903_v12, %v881_v5 }
  0xfe   :  { %v908_v18 = vadd.f32 %v904_v0, %v882_v7  ;;  %910 = vst [vmem:[#allocation11] sm:$0xff] %v906_v14 }
  0xff   :  { %v909_v2 = vadd.f32 %v905_v16, %v883_v9  ;;  %911 = vst [vmem:[#allocation11 + $0x8] sm:$0xff] %v907_v1 }
 0x100   :  { %912 = vst [vmem:[#allocation11 + $0x10] sm:$0xff] %v908_v18 }
 0x101   :  { %913 = vst [vmem:[#allocation11 + $0x18] sm:$0xff] %v909_v2 }
 0x102   :  { %1362 = shalt.err (!%p1359_p13)
}
 0x103   :  { %s1363_s9 = scalar_lea.hbm %s1954_s5, 512 }
 0x104   :  { %p1364_p0 = scmp.ne.s32.totalorder %s1954_s5, %s1363_s9  ;;  %p1367_p1 = scmp.lt.u32.totalorder %s1363_s9, %s1954_s5 }
 0x106   :  { %p1369_p2 = pnand %p1367_p1, %p1364_p0 }
 0x108   :  { %1372 = shalt.err (!%p1369_p2)
}
 0x109   :  { %925 = dma.vmem_to_hbm [thread:$0]  %s920_s30, 512, %s1954_s5, [#allocation5], %s1385_s15, %s1385_s15, %s1386_s16  }
 0x10a   :  { %1379 = dma.done.wait [#allocation5], 512  }
 0x10b   :  { %1380 = vsyncadd [#allocation5], 4294966784 }
 0x10c   :  { %929 = vsyncpa [#allocation4], 1 }
 0x10d   :  { %930 = vsyncpa [#allocation5], 1 }
 0x10e   :  { %931 = vsyncpa [#allocation6], 1 }
 0x10f   :  { %932 = vsyncpa [#allocation8], 1 }

</bundles_post_ra>
